<compile_context>
chip_gen: v6e
topology: v6e:2x2x1
jax: 0.10.0
libtpu: 0.0.40
codegen_flags: <defaults>
</compile_context>

<pallas_src>
import math

import jax
import jax.numpy as jnp
from jax import lax
from jax.experimental import pallas as pl
from jax.experimental.pallas import tpu as pltpu


def encoder_kernel(self_ref, invdeg_ref, mask_ref, feats_ref, w_ref, out_ref,
                   neigh_acc):
    k = pl.program_id(1)

    @pl.when(k == 0)
    def _init():
        neigh_acc[...] = jnp.zeros_like(neigh_acc)

    # Accumulate neighbor-feature sums over the graph-node axis M (bf16 MXU, f32 acc).
    neigh_acc[...] += jnp.dot(mask_ref[...], feats_ref[...],
                              preferred_element_type=jnp.float32)     # (tn, F)

    @pl.when(k == pl.num_programs(1) - 1)
    def _finalize():
        # Mean aggregation with the precomputed 1/max(deg, 1).
        neigh = neigh_acc[...] * invdeg_ref[...]                      # (tn, F) f32
        combined = jnp.concatenate([self_ref[...], neigh],
                                   axis=1).astype(jnp.bfloat16)       # (tn, 2F)
        # Fused K = 2F projection: W @ combined.T -> (E, tn), already (E, N)-layout.
        dn = (((1,), (1,)), ((), ()))
        acc = lax.dot_general(w_ref[...], combined, dn,
                              preferred_element_type=jnp.float32)     # (E, tn) f32
        out_ref[...] = jnp.maximum(acc, 0.0)


def encoder_forward(self_feats, inv_deg, adj_mask, features, weight,
                    *, tn=None, tm=None, vmem_budget_bytes=12 << 20):
    """relu(W @ cat([self_feats, mean_neighbor_feats], 1).T)  ->  (E, N)."""
    N, F = self_feats.shape
    M, F2 = features.shape
    E, twoF = weight.shape
    assert F2 == F and twoF == 2 * F

    # bf16 streaming inputs (0/1 mask exact in bf16); skip casts if already bf16
    # (demo builds mask / feature stream in bf16 upstream to avoid extra HBM passes).
    mask_b = adj_mask if adj_mask.dtype == jnp.bfloat16 else adj_mask.astype(jnp.bfloat16)
    feats_b = features if features.dtype == jnp.bfloat16 else features.astype(jnp.bfloat16)
    w_b = weight if weight.dtype == jnp.bfloat16 else weight.astype(jnp.bfloat16)
    self_f = self_feats.astype(jnp.float32)
    inv_deg = inv_deg.astype(jnp.float32).reshape(N, 1)

    # ---- tile selection -----------------------------------------------------
    if tn is None:
        # Multiple of 128 for MXU occupancy; keep >= 2 batch tiles (v7x megacore).
        if N % 256 == 0 and N // 256 >= 2:
            tn = 256
        elif N % 128 == 0:
            tn = 128
        else:
            tn = N
    if tm is None:
        # Keep the whole bf16 feature table VMEM-resident when it fits the budget
        # (reduction axis collapses to one step per batch tile), else stream big tiles.
        if M * F * 2 <= vmem_budget_bytes // 2:
            tm = M
        else:
            tm = 2048
            while tm > 128 and M % tm != 0:
                tm //= 2
    assert N % tn == 0 and M % tm == 0, (N, tn, M, tm)

    return pl.pallas_call(
        encoder_kernel,
        out_shape=jax.ShapeDtypeStruct((E, N), jnp.float32),
        grid_spec=pltpu.PrefetchScalarGridSpec(
            num_scalar_prefetch=0,
            grid=(N // tn, M // tm),                              # (batch tiles, M reduction)
            in_specs=[
                pl.BlockSpec((tn, F), lambda i, k: (i, 0)),       # self feats   (f32)
                pl.BlockSpec((tn, 1), lambda i, k: (i, 0)),       # 1/deg        (f32)
                pl.BlockSpec((tn, tm), lambda i, k: (i, k)),      # adjacency    (bf16)
                pl.BlockSpec((tm, F), lambda i, k: (k, 0)),       # feature tile (bf16)
                pl.BlockSpec((E, 2 * F), lambda i, k: (0, 0)),    # fused weight (bf16)
            ],
            out_specs=pl.BlockSpec((E, tn), lambda i, k: (0, i)), # (E, N) directly
            scratch_shapes=[pltpu.VMEM((tn, F), jnp.float32)],    # neighbor-sum acc
        ),
        compiler_params=pltpu.CompilerParams(
            dimension_semantics=("parallel", "arbitrary")),
    )(self_f, inv_deg, mask_b, feats_b, w_b)


def xavier_uniform(key, shape):
    fan_out, fan_in = shape
    bound = math.sqrt(6.0 / (fan_in + fan_out))
    return jax.random.uniform(key, shape, jnp.float32, -bound, bound)


if __name__ == "__main__":
    # Small, TPU-friendly (128-aligned) deterministic problem.
    M = 1024        # total nodes in graph (embedding-table rows)
    F = 128         # feature_dim
    E = 128         # embed_dim
    N = 256         # batch of nodes (2 batch tiles of 128 -> v7x megacore split)

    key = jax.random.PRNGKey(0)
    k_feat, k_w, k_adj, k_nodes = jax.random.split(key, 4)

    # Embedding table ("features" nn.Embedding weight) kept in f32 (PyTorch-faithful).
    features_f32 = jax.random.normal(k_feat, (M, F), jnp.float32)
    # Encoder weight: (embed_dim, 2*feat_dim), xavier_uniform (kept fused, not split).
    W = xavier_uniform(k_w, (E, 2 * F))

    # Batch of node ids and a deterministic sampled-neighbor adjacency mask, built
    # directly in bf16 (0/1 exact) so no extra wrapper cast pass over the big array.
    nodes = jax.random.randint(k_nodes, (N,), 0, M)
    adj_mask = (jax.random.uniform(k_adj, (N, M)) < 0.02).astype(jnp.bfloat16)
    adj_mask = adj_mask.at[jnp.arange(N), (nodes + 1) % M].set(1.0)   # >= 1 neighbor

    # Amortized-upstream bf16 copy of the feature table for the aggregation stream.
    features_b = features_f32.astype(jnp.bfloat16)

    # TODO(synk): fuse the embedding-table gather + degree computation into the
    # kernel (scalar-prefetched node ids / CSR padded-neighbor lists + manual DMA
    # gather) instead of the dense (N, M) mask formulation.
    self_feats = features_f32[nodes]                                   # (N, F) f32
    deg = adj_mask.astype(jnp.float32).sum(axis=1, keepdims=True)
    inv_deg = 1.0 / jnp.maximum(deg, 1.0)                              # (N, 1) f32

    out = encoder_forward(self_feats, inv_deg, adj_mask, features_b, W)
    jax.block_until_ready(out)

    # Pure-f32 reference (PyTorch semantics). Tolerance accounts for the kernel's
    # bf16 streaming of mask/features and the bf16 projection (f32 accumulation).
    mask_f = adj_mask.astype(jnp.float32)
    neigh_ref = (mask_f @ features_f32) / jnp.maximum(
        mask_f.sum(axis=1, keepdims=True), 1.0)
    combined = jnp.concatenate([self_feats, neigh_ref], axis=1)
    ref = jnp.maximum(W @ combined.T, 0.0)                             # (E, N)

    assert out.shape == (E, N)
    max_err = float(jnp.max(jnp.abs(out - ref)))
    assert jnp.allclose(out, ref, atol=5e-2, rtol=5e-2), max_err

    print("KERNEL_OK")
</pallas_src>

<mosaic_0001>
module attributes {stable_mosaic.version = 11 : i64} {
  func.func @encoder_kernel(%arg0: i32, %arg1: i32, %arg2: memref<128x128xf32, #tpu.memory_space<vmem>>, %arg3: memref<128x1xf32, #tpu.memory_space<vmem>>, %arg4: memref<128x1024xbf16, #tpu.memory_space<vmem>>, %arg5: memref<1024x128xbf16, #tpu.memory_space<vmem>>, %arg6: memref<128x256xbf16, #tpu.memory_space<vmem>>, %arg7: memref<128x128xf32, #tpu.memory_space<vmem>>, %arg8: memref<128x128xf32, #tpu.memory_space<vmem>>) attributes {dimension_semantics = [#tpu.dimension_semantics<parallel>, #tpu.dimension_semantics<arbitrary>], iteration_bounds = array<i64: 2, 1>, scalar_prefetch = 0 : i64, scratch_operands = 1 : i64, tpu.core_type = #tpu.core_type<tc>, window_params = [{transform_indices = @transform_0, window_bounds = array<i64: 128, 128>}, {transform_indices = @transform_1, window_bounds = array<i64: 128, 1>}, {transform_indices = @transform_2, window_bounds = array<i64: 128, 1024>}, {transform_indices = @transform_3, window_bounds = array<i64: 1024, 128>}, {pipeline_mode = #tpu.pipeline_mode<synchronous>, transform_indices = @transform_4, window_bounds = array<i64: 128, 256>}, {transform_indices = @transform_5, window_bounds = array<i64: 128, 128>}]} {
    %c0_i32 = arith.constant 0 : i32
    %0 = arith.cmpi eq, %arg1, %c0_i32 : i32
    %1 = arith.extui %0 : i1 to i32
    %c0_i32_0 = arith.constant 0 : i32
    %2 = arith.cmpi ne, %1, %c0_i32_0 : i32
    scf.if %2 {
      %cst_10 = arith.constant 0.000000e+00 : f32
      %12 = vector.broadcast %cst_10 : f32 to vector<128x128xf32>
      %c0_11 = arith.constant 0 : index
      %c0_12 = arith.constant 0 : index
      %13 = vector.load %arg8[%c0_11, %c0_12] : memref<128x128xf32, #tpu.memory_space<vmem>>, vector<128x128xf32>
      tpu.vector_store %arg8[%c0_11, %c0_12], %12 {strides = array<i32>} : memref<128x128xf32, #tpu.memory_space<vmem>>, vector<128x128xf32>,
    } else {
    }
    %c0 = arith.constant 0 : index
    %c0_1 = arith.constant 0 : index
    %3 = vector.load %arg8[%c0, %c0_1] : memref<128x128xf32, #tpu.memory_space<vmem>>, vector<128x128xf32>
    %c0_2 = arith.constant 0 : index
    %c0_3 = arith.constant 0 : index
    %4 = vector.load %arg4[%c0_2, %c0_3] : memref<128x1024xbf16, #tpu.memory_space<vmem>>, vector<128x1024xbf16>
    %c0_4 = arith.constant 0 : index
    %c0_5 = arith.constant 0 : index
    %5 = vector.load %arg5[%c0_4, %c0_5] : memref<1024x128xbf16, #tpu.memory_space<vmem>>, vector<1024x128xbf16>
    %cst = arith.constant dense<0.000000e+00> : vector<128x128xf32>
    %6 = tpu.matmul %4, %5, %cst {dimension_numbers = #tpu.dot_dimension_numbers<[1], [0], [0], [1], [0, 0, 1, 1], [], []>} : vector<128x1024xbf16>, vector<1024x128xbf16>, vector<128x128xf32> -> vector<128x128xf32>
    %7 = arith.addf %3, %6 : vector<128x128xf32>
    %c0_6 = arith.constant 0 : index
    %c0_7 = arith.constant 0 : index
    %8 = vector.load %arg8[%c0_6, %c0_7] : memref<128x128xf32, #tpu.memory_space<vmem>>, vector<128x128xf32>
    tpu.vector_store %arg8[%c0_6, %c0_7], %7 {strides = array<i32>} : memref<128x128xf32, #tpu.memory_space<vmem>>, vector<128x128xf32>,
    %c0_i32_8 = arith.constant 0 : i32
    %9 = arith.cmpi eq, %arg1, %c0_i32_8 : i32
    %10 = arith.extui %9 : i1 to i32
    %c0_i32_9 = arith.constant 0 : i32
    %11 = arith.cmpi ne, %10, %c0_i32_9 : i32
    scf.if %11 {
      %c0_10 = arith.constant 0 : index
      %c0_11 = arith.constant 0 : index
      %12 = vector.load %arg8[%c0_10, %c0_11] : memref<128x128xf32, #tpu.memory_space<vmem>>, vector<128x128xf32>
      %c0_12 = arith.constant 0 : index
      %c0_13 = arith.constant 0 : index
      %13 = vector.load %arg3[%c0_12, %c0_13] : memref<128x1xf32, #tpu.memory_space<vmem>>, vector<128x1xf32>
      %14 = vector.broadcast %13 : vector<128x1xf32> to vector<128x128xf32>
      %15 = arith.mulf %12, %14 : vector<128x128xf32>
      %c0_14 = arith.constant 0 : index
      %c0_15 = arith.constant 0 : index
      %16 = vector.load %arg2[%c0_14, %c0_15] : memref<128x128xf32, #tpu.memory_space<vmem>>, vector<128x128xf32>
      %17 = tpu.concatenate %16, %15 in 1 : vector<128x128xf32>, vector<128x128xf32> -> vector<128x256xf32>
      %18 = arith.truncf %17 : vector<128x256xf32> to vector<128x256xbf16>
      %c0_16 = arith.constant 0 : index
      %c0_17 = arith.constant 0 : index
      %19 = vector.load %arg6[%c0_16, %c0_17] : memref<128x256xbf16, #tpu.memory_space<vmem>>, vector<128x256xbf16>
      %cst_18 = arith.constant dense<0.000000e+00> : vector<128x128xf32>
      %20 = tpu.matmul %19, %18, %cst_18 {dimension_numbers = #tpu.dot_dimension_numbers<[1], [1], [0], [0], [0, 0, 1, 0], [], []>} : vector<128x256xbf16>, vector<128x256xbf16>, vector<128x128xf32> -> vector<128x128xf32>
      %cst_19 = arith.constant 0.000000e+00 : f32
      %21 = vector.broadcast %cst_19 : f32 to vector<128x128xf32>
      %22 = arith.maximumf %20, %21 : vector<128x128xf32>
      %c0_20 = arith.constant 0 : index
      %c0_21 = arith.constant 0 : index
      %23 = vector.load %arg7[%c0_20, %c0_21] : memref<128x128xf32, #tpu.memory_space<vmem>>, vector<128x128xf32>
      tpu.vector_store %arg7[%c0_20, %c0_21], %22 {strides = array<i32>} : memref<128x128xf32, #tpu.memory_space<vmem>>, vector<128x128xf32>,
    } else {
    }
    return
  }
  func.func @transform_0(%arg0: i32, %arg1: i32) -> (i32, i32) {
    %c0_i32 = arith.constant 0 : i32
    %c0_i32_0 = arith.constant 0 : i32
    return %arg0, %c0_i32 : i32, i32
  }
  func.func @transform_1(%arg0: i32, %arg1: i32) -> (i32, i32) {
    %c0_i32 = arith.constant 0 : i32
    %c0_i32_0 = arith.constant 0 : i32
    return %arg0, %c0_i32 : i32, i32
  }
  func.func @transform_2(%arg0: i32, %arg1: i32) -> (i32, i32) {
    %c0_i32 = arith.constant 0 : i32
    return %arg0, %arg1 : i32, i32
  }
  func.func @transform_3(%arg0: i32, %arg1: i32) -> (i32, i32) {
    %c0_i32 = arith.constant 0 : i32
    %c0_i32_0 = arith.constant 0 : i32
    return %arg1, %c0_i32 : i32, i32
  }
  func.func @transform_4(%arg0: i32, %arg1: i32) -> (i32, i32) {
    %c0_i32 = arith.constant 0 : i32
    %c0_i32_0 = arith.constant 0 : i32
    %c0_i32_1 = arith.constant 0 : i32
    return %c0_i32, %c0_i32_0 : i32, i32
  }
  func.func @transform_5(%arg0: i32, %arg1: i32) -> (i32, i32) {
    %c0_i32 = arith.constant 0 : i32
    %c0_i32_0 = arith.constant 0 : i32
    return %c0_i32, %arg0 : i32, i32
  }
}

</mosaic_0001>

<bundles_post_ra>
// kernel: tpu_custom_call.1
= control target key start
LH: loop header
LB: loop body
LE: loop exit
PB: predicated region body
PF: predicated region fallthrough
CT: control target
= control target key end

     0   :  { %s3541_s0 = inlined_call_operand.vmem [shape: f32[256,128], index: 0, kind: input, shape index: {}]   ;;  %s3542_s1 = inlined_call_operand.vmem [shape: f32[256,1], index: 1, kind: input, shape index: {}]   ;;  %s3543_s2 = inlined_call_operand.hbm [shape: bf16[256,1024], index: 2, kind: input, shape index: {}]   ;;  %s3544_s3 = inlined_call_operand.hbm [shape: bf16[1024,128], index: 3, kind: input, shape index: {}]   ;;  %s3545_s4 = inlined_call_operand.hbm [shape: bf16[128,256], index: 4, kind: input, shape index: {}]   ;;  %s3546_s5 = inlined_call_operand.hbm [shape: f32[128,256], index: 5, kind: output, shape index: {}]  }
   0x1   :  { %3550 = sst [smem:[#allocation13_spill]] %s3544_s3 }
   0x2   :  { %10 = vsyncpa [#allocation4], 0 }
   0x3   :  { %12 = vsyncpa [#allocation4 + $0x1], 0 }
   0x4   :  { %13 = vsyncpa [#allocation7], 0 }
   0x5   :  { %14 = vsyncpa [#allocation5], 0 }
   0x6   :  { %16 = vsyncpa [#allocation5 + $0x1], 0  ;;  %s3061_s18 = smov 0   ;;  %s3063_s19 = smov 0  }
   0x7   :  { %s3065_s20 = smov 0   ;;  %s3067_s21 = smov 0  }
   0x8   :  { %s3069_s22 = smov 0   ;;  %s3071_s23 = smov 0  }
   0x9 LB: > { %s2227_s24 = sadd.s32 4294967295, %s3015_s23   ;;  %s2228_s25 = sadd.s32 4294967294, %s3015_s23   ;;  %s3015_s23 = sphi %s3071_s23, %s22_s23   ;;  %s3011_s22 = sphi %s3069_s22, %s3568_s22   ;;  %s3007_s21 = sphi %s3067_s21, %s3567_s21   ;;  %s3003_s20 = sphi %s3065_s20, %s3566_s20   ;;  %s2999_s19 = sphi %s3063_s19, %s3565_s19   ;;  %s2995_s18 = sphi %s3061_s18, %s3564_s18  }
   0xa   : > { %p108_p0 = scmp.ne.s32.totalorder %s2999_s19, %s2995_s18  ;;  %p3095_p1 = scmp.eq.s32.totalorder %s2227_s24, 0 }
   0xb   : > { %p3099_p2 = scmp.eq.s32.totalorder %s2227_s24, 1  ;;  %p185_p3 = scmp.eq.s32.totalorder %s2228_s25, 1 }
   0xc   : > { %s3551_s26 = scalar_select %p3095_p1, 1, 0 }
   0xd   : > { %p3105_p4 = por %p3095_p1, %p108_p0  ;;  %p2229_p5 = scmp.ge.s32.totalorder %s3015_s23, 1 }
   0xe   : > { %p3110_p6 = por %p185_p3, %p108_p0  ;;  %p192_p7 = scmp.lt.s32.totalorder %s3015_s23, 3 }
   0xf   : > { %s3553_s28 = scalar_select %p3105_p4, 1, 0 }
  0x10   : > { %s3554_s29 = scalar_select %p3110_p6, 1, 0 }
  0x11   : > { %p3115_p8 = pnand %p2229_p5, %p192_p7  ;;  %s3017_s6 = smov [#allocation6]  }
  0x12   : > { %s207_s7 = sshll.u32 %s3017_s6, 4  ;;  %s3018_s9 = smov [#allocation8]   ;;  %s208_s7 = int_to_ptr.vmem [resolvable:$true] %s207_s7 }
  0x13   : > { %p2680_p9 = pneg %p3115_p8  ;;  %s220_s10 = sshll.u32 %s3018_s9, 4  ;;  %s221_s10 = int_to_ptr.vmem [resolvable:$true] %s220_s10 }
  0x14   : > { %s2862_s11 = scalar_lea.vmem %s208_s7, 8192  ;;  %p2870_p5 = scmp.lt.s32.totalorder %s208_s7, %s208_s7 }
  0x15   : > { %p3124_p11 = pnand %p2680_p9, %p3095_p1  ;;  %p2863_p13 = scmp.ne.s32.totalorder %s208_s7, %s2862_s11 }
  0x16   : > { %p2871_p7 = scmp.lt.s32.totalorder %s2862_s11, %s2862_s11 }
  0x17   : > { %p2853_p12 = pneg %p3124_p11 }
  0x18   : > { %p2872_p10 = por %p2871_p7, %p2870_p5 }
  0x19   : > { %p2865_p0 = pnand %p2863_p13, %p2853_p12 }
  0x1b   : > { %p2866_p3 = pneg %p2865_p0 }
  0x1d   : > { %p2873_p9 = pnand %p2872_p10, %p2866_p3 }
  0x1f   : > { %2876 = shalt.err (!%p2873_p9)
}
  0x20   : > { %s3019_s12 = smov 64   ;;  %s3020_s13 = smov 4  }
  0x21   : > { %s3557_s3 = sld [smem:[#allocation13_spill]]  ;;  %s2888_s16 = scalar_lea.vmem %s221_s10, 2048 }
  0x22   : > { %p2889_p6 = scmp.ne.s32.totalorder %s221_s10, %s2888_s16  ;;  %p2896_p1 = scmp.lt.s32.totalorder %s221_s10, %s221_s10 }
  0x23   : > { %p2897_p4 = scmp.lt.s32.totalorder %s2888_s16, %s2888_s16 }
  0x24   : > { %p2891_p13 = pnand %p2889_p6, %p2853_p12 }
  0x25   : > { %p2898_p5 = por %p2897_p4, %p2896_p1 }
  0x26   : > { %p2892_p0 = pneg %p2891_p13 }
  0x27   : > { %2683 = dma.hbm_to_vmem [thread:$0]  (!%p3124_p11), %s3557_s3, 8192, %s208_s7, [#allocation7], %s3019_s12, %s3019_s12, %s3020_s13  }
  0x28   : > { %p2899_p10 = pnand %p2898_p5, %p2892_p0 }
  0x2a   : > { %2902 = shalt.err (!%p2899_p10)
}
  0x2b   : > { %s3021_s17 = smov 128   ;;  %s3022_s24 = smov 8  }
  0x2c   : > { %2686 = dma.hbm_to_vmem [thread:$0]  (!%p3124_p11), %s3545_s4, 2048, %s221_s10, [#allocation7], %s3021_s17, %s3021_s17, %s3022_s24  }
  0x2d   : > { %s34_s7 = sadd.s32 1, %s3011_s22  ;;  %s95_s9 = sadd.s32 1, %s3003_s20 }
  0x2e   : > { %p36_p1 = scmp.ge.s32.totalorder %s34_s7, 2  ;;  %p102_p4 = scmp.ne.s32.totalorder %s3003_s20, %s2999_s19 }
  0x2f   : > { %p103_p6 = scmp.eq.s32.totalorder %s3015_s23, 0  ;;  %p2697_p12 = scmp.lt.s32.totalorder %s3015_s23, 2 }
  0x30   : > { %s3570_s7 = smov (%p36_p1, %s34_s7), 0  ;;  %p3156_p7 = por %p3099_p2, %p102_p4 }
  0x31   : > { %p104_p3 = por %p103_p6, %p102_p4  ;;  %s90_s8 = ssub.s32 %s3011_s22, %s3570_s7 }
  0x32   : > { %s252_s12 = sand.u32 1, %s3003_s20   ;;  %p93_p9 = scmp.eq.s32.totalorder %s90_s8, 0 }
  0x33   : > { %s2233_s10 = sshll.u32 %s252_s12, 9  ;;  %s2395_s13 = sshll.u32 %s3011_s22, 13 }
  0x34   : > { %s3165_s14 = scalar_select %p93_p9, %s3003_s20, %s95_s9  }
  0x35   : > { %s265_s17 = scalar_lea.hbm %s3543_s2, %s2395_s13  ;;  %s256_s24 = scalar_lea.vmem [#allocation3], %s2233_s10 }
  0x36   : > { %s266_s25 = sshll.u32 %s256_s24, 4  ;;  %p3172_p11 = pnand %p2697_p12, %p104_p3  ;;  %s267_s25 = int_to_ptr.vmem [resolvable:$true] %s266_s25 }
  0x37   : > { %s253_s6 = scalar_lea.sflag [#allocation4], %s252_s12  ;;  %s2916_s8 = scalar_lea.vmem %s267_s25, 8192 }
  0x38   : > { %p2905_p2 = pneg %p3172_p11  ;;  %p2917_p13 = scmp.ne.s32.totalorder %s267_s25, %s2916_s8 }
  0x39   : > { %s3023_s9 = smov [#allocation3]  }
  0x3a   : > { %p2919_p0 = pnand %p2917_p13, %p2905_p2  ;;  %s2921_s3 = sshll.u32 %s3023_s9, 4  ;;  %s2922_s3 = int_to_ptr.vmem [resolvable:$false] %s2921_s3 }
  0x3b   : > { %s2923_s13 = scalar_lea.vmem %s2922_s3, 16384  ;;  %p2924_p10 = scmp.lt.s32.totalorder %s267_s25, %s2922_s3 }
  0x3c   : > { %p2920_p5 = pneg %p2919_p0  ;;  %p2925_p1 = scmp.lt.s32.totalorder %s2923_s13, %s2916_s8 }
  0x3e   : > { %p2926_p4 = por %p2925_p1, %p2924_p10 }
  0x40   : > { %p2927_p6 = pnand %p2926_p4, %p2920_p5 }
  0x42   : > { %2930 = shalt.err (!%p2927_p6)
}
  0x43   : > { %s3024_s10 = smov 512   ;;  %s3025_s15 = smov 32  }
  0x44   : > { %2690 = dma.hbm_to_vmem [thread:$0]  (!%p3172_p11), %s265_s17, 8192, %s267_s25, %s253_s6, %s3024_s10, %s3024_s10, %s3025_s15  }
  0x45   : > { %278 = sbr.rel (%p3115_p8) target bundleno = 804 (0x324), region = 40  ;;  %s3183_s12 = sand.u32 (!%p3115_p8), 1, %s2999_s19  }
  0x46   : > { %s2238_s16 = sshll.u32 (!%p3115_p8), %s3183_s12, 9  ;;  %s281_s3 = scalar_lea.sflag (!%p3115_p8), [#allocation4], %s3183_s12 }
  0x47   : > { %s3187_s24 = scalar_lea.vmem (!%p3115_p8), [#allocation3], %s2238_s16  ;;  %p3560_p12 = scmp.ne.s32.totalorder (!%p3115_p8), %s3553_s28, 0 }
  0x4a   : > { %2982 = dma.done.wait (%p3560_p12), %s281_s3, 8192  }
  0x4b   : > { %2984 = vsyncadd (%p3560_p12), %s281_s3, 4294959104  ;;  %p3561_p3 = scmp.ne.s32.totalorder %s3551_s26, 0 }
  0x4d   : > { %2986 = dma.done.wait (%p3561_p3), [#allocation7], 10240  }
  0x4e   : > { %2988 = vsyncadd (%p3561_p3), [#allocation7], 4294957056  ;;  %v2763_v0 = vld [vmem:[#allocation6 + $0x78] sm:$0xff]   ;;  %v2765_v2 = vld [vmem:[#allocation6 + $0x70] sm:$0xff]   ;;  %s2242_s26 = sshll.u32 %s3007_s21, 4  ;;  %s2241_s9 = sshll.u32 %s3183_s12, 7 }
  0x4f   : > { %v2764_v1 = vld [vmem:[#allocation6 + $0x38] sm:$0xff]   ;;  %2652 = vmatprep.subr.bf16.mxu1 %v2763_v0  ;;  %2396 = vmatprep.subr.bf16.mxu0 %v2763_v0  ;;  %v2766_v3 = vld [vmem:[#allocation6 + $0x30] sm:$0xff]   ;;  %v2767_v4 = vld [vmem:[#allocation6 + $0x68] sm:$0xff]   ;;  %v3026_v0 = vmov 0   ;;  %p330_p8 = scmp.lt.s32.totalorder %s2242_s26, 31  ;;  %s3468_s13 = scalar_lea.vmem [#allocation9], %s2241_s9 }
  0x50   : > { %2660 = vmatpush3.bf16.msra.mxu1 %v2764_v1  ;;  %2397 = vmatpush3.bf16.msra.mxu0 %v2764_v1  ;;  %v2768_v5 = vld [vmem:[#allocation6 + $0x28] sm:$0xff]   ;;  %v2769_v6 = vld [vmem:[#allocation6 + $0x60] sm:$0xff]   ;;  %v2771_v8 = vld [vmem:[#allocation6 + $0x58] sm:$0xff]   ;;  %s2391_s10 = sshll.u32 %s3007_s21, 7  ;;  %s2098_s15 = sshll.u32 %s3468_s13, 4  ;;  %s3492_s15 = int_to_ptr.vmem [resolvable:$true] %s2098_s15 }
  0x51   : > { %2653 = vmatprep.subr.bf16.mxu1 %v2765_v2  ;;  %2398 = vmatprep.subr.bf16.mxu0 %v2765_v2  ;;  %v2770_v7 = vld [vmem:[#allocation6 + $0x20] sm:$0xff]   ;;  %v2772_v9 = vld [vmem:[#allocation6 + $0x18] sm:$0xff]   ;;  %v2773_v10 = vld [vmem:[#allocation6 + $0x50] sm:$0xff]   ;;  %s3572_s26 = smov (!%p330_p8, %s2242_s26), 31  ;;  %s2931_s21 = scalar_lea.vmem %s3492_s15, 2048 }
  0x52   : > { %v413_v11 = vld [vmem:[%s3187_s24 + $0x100] sm:$0xff]  ;;  %v2774_v16 = vld [vmem:[#allocation6 + $0x10] sm:$0xff]   ;;  %v2775_v18 = vld [vmem:[#allocation6 + $0x48] sm:$0xff]   ;;  %2761 = vset.pattern.permute.xlu0 %v3026_v0  ;;  %2762 = vset.pattern.permute.xlu1 %v3026_v0  ;;  %s2243_s28 = sshll.u32 %s3572_s26, 3  ;;  %s2086_s26 = scalar_lea.sflag [#allocation5], %s3183_s12 }
  0x53   : > { %v417_v12 = vld [vmem:[%s3187_s24 + $0x120] sm:$0xff]  ;;  %v2776_v19 = vld [vmem:[#allocation6 + $0x8] sm:$0xff]   ;;  %v2779_v22 = vld [vmem:[#allocation6 + $0xf8] sm:$0xff]   ;;  %s3238_s25 = scalar_lea.vmem %s3542_s1, %s2243_s28  ;;  %s3435_s8 = scalar_lea.vmem %s3541_s0, %s2243_s28 }
  0x54   : > { %2661 = vmatpush3.bf16.msra.mxu1 %v2766_v3  ;;  %2399 = vmatpush3.bf16.msra.mxu0 %v2766_v3  ;;  %v2279_v13 = vcombine.high %v413_v11, %v417_v12  ;;  %v381_v14 = vld [vmem:[%s3187_s24] sm:$0xff]  ;;  %v2781_v23 = vld [vmem:[#allocation6 + $0x178] sm:$0xff]   ;;  %v2278_v29 = vcombine.low %v413_v11, %v417_v12  ;;  %v2783_v32 = vld [vmem:[#allocation6 + $0xf0] sm:$0xff]   ;;  %p2932_p9 = scmp.ne.s32.totalorder %s3492_s15, %s2931_s21  ;;  %s3027_s28 = smov [#allocation9]  }
  0x55   : > { %2654 = vmatprep.subr.bf16.mxu1 %v2767_v4  ;;  %2400 = vmatprep.subr.bf16.mxu0 %v2767_v4  ;;  %v385_v15 = vld [vmem:[%s3187_s24 + $0x20] sm:$0xff]  ;;  %v2780_v26 = vld [vmem:[#allocation6 + $0xb8] sm:$0xff]   ;;  %v2785_v33 = vld [vmem:[#allocation6 + $0x170] sm:$0xff]   ;;  %s2935_s30 = sshll.u32 %s3027_s28, 4  ;;  %s2936_s30 = int_to_ptr.vmem [resolvable:$false] %s2935_s30 }
  0x56   : > { %v2247_v17 = vcombine.high %v381_v14, %v385_v15  ;;  %1341 = vmatprep.mubr.bf16.mxu1 %v2279_v13  ;;  %v2777_v20 = vld [vmem:[#allocation6 + $0x40] sm:$0xff]   ;;  %v2782_v27 = vld [vmem:[#allocation6 + $0x138] sm:$0xff]   ;;  %v2246_v30 = vcombine.low %v381_v14, %v385_v15  ;;  %v2784_v34 = vld [vmem:[#allocation6 + $0xb0] sm:$0xff]   ;;  %p2933_p11 = pnand %p2932_p9, %p3156_p7  ;;  %s2937_s17 = scalar_lea.vmem %s2936_s30, 4096 }
  0x57   : > { %v2778_v21 = vld [vmem:[#allocation6] sm:$0xff]   ;;  %v2786_v37 = vld [vmem:[#allocation6 + $0x130] sm:$0xff]   ;;  %v2787_v38 = vld [vmem:[#allocation6 + $0xe8] sm:$0xff]   ;;  %p2938_p13 = scmp.lt.s32.totalorder %s3492_s15, %s2936_s30  ;;  %p2939_p0 = scmp.lt.s32.totalorder %s2937_s17, %s2931_s21 }
  0x58   : > { %2662 = vmatpush3.bf16.msra.mxu1 %v2768_v5  ;;  %2401 = vmatpush3.bf16.msra.mxu0 %v2768_v5  ;;  %v421_v24 = vld [vmem:[%s3187_s24 + $0x140] sm:$0xff]  ;;  %v2789_v39 = vld [vmem:[#allocation6 + $0x168] sm:$0xff]   ;;  %v2795_v54 = vld [vmem:[#allocation6 + $0xd8] sm:$0xff]   ;;  %p2934_p2 = pneg %p2933_p11 }
  0x59   : > { %2655 = vmatprep.subr.bf16.mxu1 %v2769_v6  ;;  %2402 = vmatprep.subr.bf16.mxu0 %v2769_v6  ;;  %v425_v25 = vld [vmem:[%s3187_s24 + $0x160] sm:$0xff]  ;;  %v2788_v42 = vld [vmem:[#allocation6 + $0xa8] sm:$0xff]   ;;  %v2797_v55 = vld [vmem:[#allocation6 + $0x158] sm:$0xff]   ;;  %p2940_p5 = por %p2939_p0, %p2938_p13 }
  0x5a   : > { %1309 = vmatprep.mubr.bf16.mxu0 %v2247_v17  ;;  %v389_v28 = vld [vmem:[%s3187_s24 + $0x40] sm:$0xff]  ;;  %v2287_v35 = vcombine.high %v421_v24, %v425_v25  ;;  %v2790_v43 = vld [vmem:[#allocation6 + $0x128] sm:$0xff]   ;;  %v2286_v45 = vcombine.low %v421_v24, %v425_v25  ;;  %v2796_v57 = vld [vmem:[#allocation6 + $0x98] sm:$0xff]  }
  0x5b   : > { %v393_v31 = vld [vmem:[%s3187_s24 + $0x60] sm:$0xff]  ;;  %v2798_v58 = vld [vmem:[#allocation6 + $0x118] sm:$0xff]   ;;  %v2799_v1 = vld [vmem:[#allocation6 + $0xd0] sm:$0xff]   ;;  %p2941_p10 = pnand %p2940_p5, %p2934_p2 }
  0x5c   : > { %2663 = vmatpush3.bf16.msra.mxu1 %v2770_v7  ;;  %2403 = vmatpush3.bf16.msra.mxu0 %v2770_v7  ;;  %v2255_v36 = vcombine.high %v389_v28, %v393_v31  ;;  %v429_v40 = vld [vmem:[%s3187_s24 + $0x180] sm:$0xff]  ;;  %v2254_v46 = vcombine.low %v389_v28, %v393_v31  ;;  %v2801_v2 = vld [vmem:[#allocation6 + $0x150] sm:$0xff]   ;;  %v2803_v7 = vld [vmem:[#allocation6 + $0xc8] sm:$0xff]  }
  0x5d   : > { %2656 = vmatprep.subr.bf16.mxu1 %v2771_v8  ;;  %2404 = vmatprep.subr.bf16.mxu0 %v2771_v8  ;;  %v433_v41 = vld [vmem:[%s3187_s24 + $0x1a0] sm:$0xff]  ;;  %v2800_v5 = vld [vmem:[#allocation6 + $0x90] sm:$0xff]   ;;  %v2805_v8 = vld [vmem:[#allocation6 + $0x148] sm:$0xff]  }
  0x5e   : > { %v397_v44 = vld [vmem:[%s3187_s24 + $0x80] sm:$0xff]  ;;  %v2295_v51 = vcombine.high %v429_v40, %v433_v41  ;;  %v2294_v61 = vcombine.low %v429_v40, %v433_v41  ;;  %v2802_v6 = vld [vmem:[#allocation6 + $0x110] sm:$0xff]   ;;  %v382_v11 = vld [vmem:[%s3187_s24 + $0x8] sm:$0xff] }
  0x5f   : > { %v401_v47 = vld [vmem:[%s3187_s24 + $0xa0] sm:$0xff]  ;;  %v386_v14 = vld [vmem:[%s3187_s24 + $0x28] sm:$0xff]  ;;  %v383_v15 = vld [vmem:[%s3187_s24 + $0x10] sm:$0xff] }
  0x60   : > { %2664 = vmatpush3.bf16.msra.mxu1 %v2772_v9  ;;  %2405 = vmatpush3.bf16.msra.mxu0 %v2772_v9  ;;  %v2791_v48 = vld [vmem:[#allocation6 + $0xe0] sm:$0xff]   ;;  %v2263_v52 = vcombine.high %v397_v44, %v401_v47  ;;  %v2262_v62 = vcombine.low %v397_v44, %v401_v47  ;;  %v2804_v9 = vld [vmem:[#allocation6 + $0x88] sm:$0xff]   ;;  %v2248_v28 = vcombine.low %v382_v11, %v386_v14 }
  0x61   : > { %2657 = vmatprep.subr.bf16.mxu1 %v2773_v10  ;;  %2406 = vmatprep.subr.bf16.mxu0 %v2773_v10  ;;  %v2793_v49 = vld [vmem:[#allocation6 + $0x160] sm:$0xff]   ;;  %v2806_v10 = vld [vmem:[#allocation6 + $0x108] sm:$0xff]  }
  0x62   : > { %v2792_v50 = vld [vmem:[#allocation6 + $0xa0] sm:$0xff]   ;;  %v390_v24 = vld [vmem:[%s3187_s24 + $0x48] sm:$0xff] }
  0x63   : > { %v2794_v53 = vld [vmem:[#allocation6 + $0x120] sm:$0xff]   ;;  %v394_v25 = vld [vmem:[%s3187_s24 + $0x68] sm:$0xff] }
  0x64   : > { %2665 = vmatpush3.bf16.msra.mxu1 %v2774_v16  ;;  %2407 = vmatpush3.bf16.msra.mxu0 %v2774_v16  ;;  %v437_v56 = vld [vmem:[%s3187_s24 + $0x1c0] sm:$0xff]  ;;  %v387_v16 = vld [vmem:[%s3187_s24 + $0x30] sm:$0xff]  ;;  %v2257_v31 = vcombine.high %v390_v24, %v394_v25  ;;  %v2256_v40 = vcombine.low %v390_v24, %v394_v25  ;;  %v2816_v44 = vld [vmem:[#allocation6 + $0x1a8] sm:$0xff]  }
  0x65   : > { %2658 = vmatprep.subr.bf16.mxu1 %v2775_v18  ;;  %2408 = vmatprep.subr.bf16.mxu0 %v2775_v18  ;;  %v441_v59 = vld [vmem:[%s3187_s24 + $0x1e0] sm:$0xff]  ;;  %v410_v47 = vld [vmem:[%s3187_s24 + $0xe8] sm:$0xff] }
  0x66   : > { %v405_v60 = vld [vmem:[%s3187_s24 + $0xc0] sm:$0xff]  ;;  %v2303_v3 = vcombine.high %v437_v56, %v441_v59  ;;  %v2302_v12 = vcombine.low %v437_v56, %v441_v59  ;;  %v2820_v56 = vld [vmem:[#allocation6 + $0x198] sm:$0xff]   ;;  %v418_v59 = vld [vmem:[%s3187_s24 + $0x128] sm:$0xff] }
  0x67   : > { %v409_v63 = vld [vmem:[%s3187_s24 + $0xe0] sm:$0xff]  ;;  %v2823_v0 = vld [vmem:[#allocation6 + $0x1c8] sm:$0xff]  }
  0x68   : > { %2666 = vmatpush3.bf16.msra.mxu1 %v2776_v19  ;;  %2409 = vmatpush3.bf16.msra.mxu0 %v2776_v19  ;;  %v2271_v4 = vcombine.high %v405_v60, %v409_v63  ;;  %v2270_v13 = vcombine.low %v405_v60, %v409_v63  ;;  %v2807_v17 = vld [vmem:[#allocation6 + $0xc0] sm:$0xff]   ;;  %v2249_v19 = vcombine.high %v382_v11, %v386_v14  ;;  %v415_v60 = vld [vmem:[%s3187_s24 + $0x110] sm:$0xff]  ;;  %v426_v11 = vld [vmem:[%s3187_s24 + $0x168] sm:$0xff] }
  0x69   : > { %2659 = vmatprep.subr.bf16.mxu1 %v2777_v20  ;;  %2410 = vmatprep.subr.bf16.mxu0 %v2777_v20  ;;  %v2809_v18 = vld [vmem:[#allocation6 + $0x140] sm:$0xff]   ;;  %v2251_v20 = vcombine.high %v383_v15, %v387_v16  ;;  %v1730_v63 = vld [vmem:[%s3238_s25 + $0x70] sm:$0xff]  ;;  %v430_v24 = vld [vmem:[%s3187_s24 + $0x188] sm:$0xff] }
  0x6a   : > { %1804 = vperm.xlu0 %2761, %v1730_v63   ;;  %v2826_v14 = vld [vmem:[#allocation6 + $0x180] sm:$0xff]   ;;  %v434_v25 = vld [vmem:[%s3187_s24 + $0x1a8] sm:$0xff] }
  0x6c   : > { %2667 = vmatpush3.bf16.msra.mxu1 %v2778_v21  ;;  %2411 = vmatpush3.bf16.msra.mxu0 %v2778_v21  ;;  %v2808_v21 = vld [vmem:[#allocation6 + $0x80] sm:$0xff]  }
  0x6d   : > { %2460 = vmatprep.subr.bf16.mxu1 %v2779_v22  ;;  %2524 = vmatprep.subr.bf16.mxu0 %v2781_v23  ;;  %v2810_v22 = vld [vmem:[#allocation6 + $0x100] sm:$0xff]   ;;  %v2811_v23 = vld [vmem:[#allocation6 + $0x1f8] sm:$0xff]  }
  0x6f   : > { %1342 = vmatmul.mubr.bf16.vlgmr.msra.gmra.mxu1 %v2278_v29  ;;  %1310 = vmatmul.mubr.bf16.vlgmr.msra.gmra.mxu0 %v2246_v30  ;;  %v2250_v29 = vcombine.low %v383_v15, %v387_v16  ;;  %v2812_v30 = vld [vmem:[#allocation6 + $0x1b8] sm:$0xff]   ;;  %v1726_v15 = vld [vmem:[%s3238_s25 + $0x50] sm:$0xff] }
  0x70   : > { %2461 = vmatpush3.bf16.msra.mxu1 %v2780_v26  ;;  %2525 = vmatpush3.bf16.msra.mxu0 %v2782_v27  ;;  %v391_v26 = vld [vmem:[%s3187_s24 + $0x50] sm:$0xff]  ;;  %v1727_v16 = vld [vmem:[%s3238_s25 + $0x58] sm:$0xff] }
  0x71   : > { %2462 = vmatprep.subr.bf16.mxu1 %v2783_v32  ;;  %2526 = vmatprep.subr.bf16.mxu0 %v2785_v33  ;;  %v395_v27 = vld [vmem:[%s3187_s24 + $0x70] sm:$0xff] }
  0x72   : > { %1349 = vmatprep.mubr.bf16.mxu1 %v2287_v35  ;;  %1317 = vmatprep.mubr.bf16.mxu0 %v2255_v36  ;;  %v2813_v32 = vld [vmem:[#allocation6 + $0x1f0] sm:$0xff]   ;;  %v2259_v33 = vcombine.high %v391_v26, %v395_v27  ;;  %v398_v35 = vld [vmem:[%s3187_s24 + $0x88] sm:$0xff]  ;;  %v2258_v41 = vcombine.low %v391_v26, %v395_v27 }
  0x73   : > { %v402_v36 = vld [vmem:[%s3187_s24 + $0xa8] sm:$0xff]  ;;  %v431_v26 = vld [vmem:[%s3187_s24 + $0x190] sm:$0xff] }
  0x74   : > { %2463 = vmatpush3.bf16.msra.mxu1 %v2784_v34  ;;  %2527 = vmatpush3.bf16.msra.mxu0 %v2786_v37  ;;  %v2814_v34 = vld [vmem:[#allocation6 + $0x1b0] sm:$0xff]   ;;  %v2815_v37 = vld [vmem:[#allocation6 + $0x1e8] sm:$0xff]  }
  0x75   : > { %2464 = vmatprep.subr.bf16.mxu1 %v2787_v38  ;;  %2528 = vmatprep.subr.bf16.mxu0 %v2789_v39  ;;  %v399_v38 = vld [vmem:[%s3187_s24 + $0x90] sm:$0xff] }
  0x76   : > { %v403_v39 = vld [vmem:[%s3187_s24 + $0xb0] sm:$0xff] }
  0x77   : > { %1350 = vmatmul.mubr.bf16.gmra.mxu1 %v2286_v45  ;;  %1318 = vmatmul.mubr.bf16.gmra.mxu0 %v2254_v46  ;;  %v2817_v45 = vld [vmem:[#allocation6 + $0x1e0] sm:$0xff]   ;;  %v406_v46 = vld [vmem:[%s3187_s24 + $0xc8] sm:$0xff]  ;;  %v435_v27 = vld [vmem:[%s3187_s24 + $0x1b0] sm:$0xff] }
  0x78   : > { %2465 = vmatpush3.bf16.msra.mxu1 %v2788_v42  ;;  %2529 = vmatpush3.bf16.msra.mxu0 %v2790_v43  ;;  %v2265_v42 = vcombine.high %v398_v35, %v402_v36  ;;  %v2267_v43 = vcombine.high %v399_v38, %v403_v39 }
  0x79   : > { %2466 = vmatprep.subr.bf16.mxu1 %v2791_v48  ;;  %2530 = vmatprep.subr.bf16.mxu0 %v2793_v49  ;;  %v407_v48 = vld [vmem:[%s3187_s24 + $0xd0] sm:$0xff] }
  0x7a   : > { %1357 = vmatprep.mubr.bf16.mxu1 %v2295_v51  ;;  %1325 = vmatprep.mubr.bf16.mxu0 %v2263_v52  ;;  %v411_v49 = vld [vmem:[%s3187_s24 + $0xf0] sm:$0xff]  ;;  %v2819_v51 = vld [vmem:[#allocation6 + $0x1d8] sm:$0xff]   ;;  %v2264_v52 = vcombine.low %v398_v35, %v402_v36  ;;  %v438_v36 = vld [vmem:[%s3187_s24 + $0x1c8] sm:$0xff] }
  0x7b   : > { %v1718_v35 = vld [vmem:[%s3238_s25 + $0x10] sm:$0xff] }
  0x7c   : > { %2467 = vmatpush3.bf16.msra.mxu1 %v2792_v50  ;;  %2531 = vmatpush3.bf16.msra.mxu0 %v2794_v53  ;;  %v2818_v50 = vld [vmem:[#allocation6 + $0x1a0] sm:$0xff]   ;;  %v2266_v53 = vcombine.low %v399_v38, %v403_v39  ;;  %v439_v38 = vld [vmem:[%s3187_s24 + $0x1d0] sm:$0xff] }
  0x7d   : > { %2468 = vmatprep.subr.bf16.mxu1 %v2795_v54  ;;  %2532 = vmatprep.subr.bf16.mxu0 %v2797_v55  ;;  %v2273_v54 = vcombine.high %v406_v46, %v410_v47  ;;  %v2275_v55 = vcombine.high %v407_v48, %v411_v49  ;;  %v443_v39 = vld [vmem:[%s3187_s24 + $0x1f0] sm:$0xff] }
  0x7f   : > { %1358 = vmatmul.mubr.bf16.gmra.mxu1 %v2294_v61  ;;  %1326 = vmatmul.mubr.bf16.gmra.mxu0 %v2262_v62  ;;  %v419_v61 = vld [vmem:[%s3187_s24 + $0x130] sm:$0xff] }
  0x80   : > { %2469 = vmatpush3.bf16.msra.mxu1 %v2796_v57  ;;  %2533 = vmatpush3.bf16.msra.mxu0 %v2798_v58  ;;  %v2821_v57 = vld [vmem:[#allocation6 + $0x1d0] sm:$0xff]   ;;  %v414_v58 = vld [vmem:[%s3187_s24 + $0x108] sm:$0xff] }
  0x81   : > { %2470 = vmatprep.subr.bf16.mxu1 %v2799_v1  ;;  %2534 = vmatprep.subr.bf16.mxu0 %v2801_v2  ;;  %v2822_v62 = vld [vmem:[#allocation6 + $0x190] sm:$0xff]   ;;  %v1728_v1 = vld [vmem:[%s3238_s25 + $0x60] sm:$0xff]  ;;  %v2272_v2 = vcombine.low %v406_v46, %v410_v47  ;;  %v1717_v46 = vld [vmem:[%s3238_s25 + $0x8] sm:$0xff] }
  0x82   : > { %1365 = vmatprep.mubr.bf16.mxu1 %v2303_v3  ;;  %1333 = vmatprep.mubr.bf16.mxu0 %v2271_v4  ;;  %v2274_v3 = vcombine.low %v407_v48, %v411_v49  ;;  %v1731_v4 = vld [vmem:[%s3238_s25 + $0x78] sm:$0xff] }
  0x83   : > { %1794 = vperm.xlu1 %2762, %v1728_v1   ;;  %1809 = vperm.xlu0 %2761, %v1731_v4   ;;  %v384_v47 = vld [vmem:[%s3187_s24 + $0x18] sm:$0xff] }
  0x84   : > { %2471 = vmatpush3.bf16.msra.mxu1 %v2800_v5  ;;  %2535 = vmatpush3.bf16.msra.mxu0 %v2802_v6  ;;  %v2281_v5 = vcombine.high %v414_v58, %v418_v59  ;;  %v2283_v6 = vcombine.high %v415_v60, %v419_v61  ;;  %v388_v48 = vld [vmem:[%s3187_s24 + $0x38] sm:$0xff] }
  0x85   : > { %2472 = vmatprep.subr.bf16.mxu1 %v2803_v7  ;;  %2536 = vmatprep.subr.bf16.mxu0 %v2805_v8  ;;  %v2824_v7 = vld [vmem:[#allocation6 + $0x188] sm:$0xff]   ;;  %v2825_v8 = vld [vmem:[#allocation6 + $0x1c0] sm:$0xff]   ;;  %v420_v1 = vld [vmem:[%s3187_s24 + $0x138] sm:$0xff] }
  0x86   : > { %v424_v4 = vld [vmem:[%s3187_s24 + $0x158] sm:$0xff] }
  0x87   : > { %1366 = vmatmul.mubr.bf16.gmra.mxu1 %v2302_v12  ;;  %1334 = vmatmul.mubr.bf16.gmra.mxu0 %v2270_v13  ;;  %v423_v12 = vld [vmem:[%s3187_s24 + $0x150] sm:$0xff] }
  0x88   : > { %2473 = vmatpush3.bf16.msra.mxu1 %v2804_v9  ;;  %2537 = vmatpush3.bf16.msra.mxu0 %v2806_v10  ;;  %v1729_v9 = vld [vmem:[%s3238_s25 + $0x68] sm:$0xff]  ;;  %v427_v13 = vld [vmem:[%s3187_s24 + $0x170] sm:$0xff] }
  0x89   : > { %2474 = vmatprep.subr.bf16.mxu1 %v2807_v17  ;;  %2538 = vmatprep.subr.bf16.mxu0 %v2809_v18  ;;  %v422_v10 = vld [vmem:[%s3187_s24 + $0x148] sm:$0xff]  ;;  %v1724_v17 = vld [vmem:[%s3238_s25 + $0x40] sm:$0xff]  ;;  %v2280_v18 = vcombine.low %v414_v58, %v418_v59 }
  0x8a   : > { %1406 = vmatprep.mubr.bf16.mxu1 %v2249_v19  ;;  %1503 = vmatprep.mubr.bf16.mxu0 %v2251_v20  ;;  %v2282_v19 = vcombine.low %v415_v60, %v419_v61  ;;  %v2289_v20 = vcombine.high %v422_v10, %v426_v11  ;;  %v408_v60 = vld [vmem:[%s3187_s24 + $0xd8] sm:$0xff] }
  0x8b   : > { %1799 = vperm.xlu1 %2762, %v1729_v9   ;;  %1784 = vperm.xlu0 %2761, %v1726_v15   ;;  %v412_v61 = vld [vmem:[%s3187_s24 + $0xf8] sm:$0xff] }
  0x8c   : > { %2475 = vmatpush3.bf16.msra.mxu1 %v2808_v21  ;;  %2539 = vmatpush3.bf16.msra.mxu0 %v2810_v22  ;;  %v2291_v21 = vcombine.high %v423_v12, %v427_v13  ;;  %v1725_v22 = vld [vmem:[%s3238_s25 + $0x48] sm:$0xff]  ;;  %v2277_v63 = vcombine.high %v408_v60, %v412_v61  ;;  %v436_v9 = vld [vmem:[%s3187_s24 + $0x1b8] sm:$0xff] }
  0x8d   : > { %2588 = vmatprep.subr.bf16.mxu1 %v2811_v23  ;;  %v1722_v23 = vld [vmem:[%s3238_s25 + $0x30] sm:$0xff] }
  0x8f   : > { %1407 = vmatmul.mubr.bf16.vlgmr.msra.gmra.mxu1 %v2248_v28  ;;  %1504 = vmatmul.mubr.bf16.vlgmr.msra.gmra.mxu0 %v2250_v29  ;;  %v1723_v28 = vld [vmem:[%s3238_s25 + $0x38] sm:$0xff]  ;;  %v2288_v29 = vcombine.low %v422_v10, %v426_v11 }
  0x90   : > { %2589 = vmatpush3.bf16.msra.mxu1 %v2812_v30  ;;  %1414 = vmatprep.mubr.bf16.mxu1 %v2257_v31  ;;  %v2290_v30 = vcombine.low %v423_v12, %v427_v13  ;;  %v1720_v31 = vld [vmem:[%s3238_s25 + $0x20] sm:$0xff]  ;;  %v440_v12 = vld [vmem:[%s3187_s24 + $0x1d8] sm:$0xff] }
  0x91   : > { %2590 = vmatprep.subr.bf16.mxu1 %v2813_v32  ;;  %1511 = vmatprep.mubr.bf16.mxu0 %v2259_v33  ;;  %v2297_v32 = vcombine.high %v430_v24, %v434_v25  ;;  %v2299_v33 = vcombine.high %v431_v26, %v435_v27  ;;  %v444_v13 = vld [vmem:[%s3187_s24 + $0x1f8] sm:$0xff] }
  0x92   : > { %1789 = vperm.xlu1 %2762, %v1727_v16   ;;  %1774 = vperm.xlu0 %2761, %v1724_v17   ;;  %v2309_v15 = vcombine.high %v440_v12, %v444_v13  ;;  %v2308_v16 = vcombine.low %v440_v12, %v444_v13 }
  0x94   : > { %2591 = vmatpush3.bf16.msra.mxu1 %v2814_v34  ;;  %v1721_v34 = vld [vmem:[%s3238_s25 + $0x28] sm:$0xff] }
  0x95   : > { %2592 = vmatprep.subr.bf16.mxu1 %v2815_v37  ;;  %v442_v37 = vld [vmem:[%s3187_s24 + $0x1e8] sm:$0xff] }
  0x96   : > { %1779 = vperm.xlu1 %2762, %v1725_v22   ;;  %1764 = vperm.xlu0 %2761, %v1722_v23   ;;  %v2304_v49 = vcombine.low %v438_v36, %v442_v37 }
  0x97   : > { %1415 = vmatmul.mubr.bf16.gmra.mxu1 %v2256_v40  ;;  %1512 = vmatmul.mubr.bf16.gmra.mxu0 %v2258_v41  ;;  %v1719_v40 = vld [vmem:[%s3238_s25 + $0x18] sm:$0xff]  ;;  %v2296_v41 = vcombine.low %v430_v24, %v434_v25 }
  0x98   : > { %1422 = vmatprep.mubr.bf16.mxu1 %v2265_v42  ;;  %1519 = vmatprep.mubr.bf16.mxu0 %v2267_v43  ;;  %v2298_v42 = vcombine.low %v431_v26, %v435_v27  ;;  %v1716_v43 = vld [vmem:[%s3238_s25] sm:$0xff] }
  0x99   : > { %2593 = vmatpush3.bf16.msra.mxu1 %v2816_v44  ;;  %v2305_v44 = vcombine.high %v438_v36, %v442_v37 }
  0x9a   : > { %2594 = vmatprep.subr.bf16.mxu1 %v2817_v45  ;;  %1769 = vperm.xlu1 %2762, %v1723_v28   ;;  %v2307_v45 = vcombine.high %v439_v38, %v443_v39 }
  0x9b   : > { %1754 = vperm.xlu0 %2761, %v1720_v31  }
  0x9d   : > { %2595 = vmatpush3.bf16.msra.mxu1 %v2818_v50  ;;  %v2306_v50 = vcombine.low %v439_v38, %v443_v39 }
  0x9e   : > { %2596 = vmatprep.subr.bf16.mxu1 %v2819_v51  ;;  %1759 = vperm.xlu1 %2762, %v1721_v34   ;;  %v2253_v51 = vcombine.high %v384_v47, %v388_v48 }
  0x9f   : > { %1423 = vmatmul.mubr.bf16.gmra.mxu1 %v2264_v52  ;;  %1520 = vmatmul.mubr.bf16.gmra.mxu0 %v2266_v53  ;;  %v392_v52 = vld [vmem:[%s3187_s24 + $0x58] sm:$0xff] }
  0xa0   : > { %1430 = vmatprep.mubr.bf16.mxu1 %v2273_v54  ;;  %1527 = vmatprep.mubr.bf16.mxu0 %v2275_v55  ;;  %v396_v53 = vld [vmem:[%s3187_s24 + $0x78] sm:$0xff]  ;;  %v2252_v54 = vcombine.low %v384_v47, %v388_v48 }
  0xa1   : > { %2597 = vmatpush3.bf16.msra.mxu1 %v2820_v56  ;;  %1744 = vperm.xlu0 %2761, %v1718_v35   ;;  %v2261_v55 = vcombine.high %v392_v52, %v396_v53  ;;  %v400_v56 = vld [vmem:[%s3187_s24 + $0x98] sm:$0xff]  ;;  %v2260_v58 = vcombine.low %v392_v52, %v396_v53 }
  0xa2   : > { %2598 = vmatprep.subr.bf16.mxu1 %v2821_v57  ;;  %1749 = vperm.xlu1 %2762, %v1719_v40   ;;  %v404_v57 = vld [vmem:[%s3187_s24 + $0xb8] sm:$0xff] }
  0xa3   : > { %v2269_v59 = vcombine.high %v400_v56, %v404_v57 }
  0xa5   : > { %2599 = vmatpush3.bf16.msra.mxu1 %v2822_v62  ;;  %1734 = vperm.xlu0 %2761, %v1716_v43   ;;  %v2268_v62 = vcombine.low %v400_v56, %v404_v57 }
  0xa6   : > { %2600 = vmatprep.subr.bf16.mxu1 %v2823_v0  ;;  %1739 = vperm.xlu1 %2762, %v1717_v46   ;;  %v416_v0 = vld [vmem:[%s3187_s24 + $0x118] sm:$0xff] }
  0xa7   : > { %1431 = vmatmul.mubr.bf16.gmra.mxu1 %v2272_v2  ;;  %1528 = vmatmul.mubr.bf16.gmra.mxu0 %v2274_v3  ;;  %v2276_v2 = vcombine.low %v408_v60, %v412_v61  ;;  %v2285_v3 = vcombine.high %v416_v0, %v420_v1 }
  0xa8   : > { %1438 = vmatprep.mubr.bf16.mxu1 %v2281_v5  ;;  %1535 = vmatprep.mubr.bf16.mxu0 %v2283_v6  ;;  %v428_v5 = vld [vmem:[%s3187_s24 + $0x178] sm:$0xff]  ;;  %v2284_v6 = vcombine.low %v416_v0, %v420_v1 }
  0xa9   : > { %2601 = vmatpush3.bf16.msra.mxu1 %v2824_v7  ;;  %v2293_v7 = vcombine.high %v424_v4, %v428_v5  ;;  %v2292_v10 = vcombine.low %v424_v4, %v428_v5 }
  0xaa   : > { %2602 = vmatprep.subr.bf16.mxu1 %v2825_v8  ;;  %v432_v8 = vld [vmem:[%s3187_s24 + $0x198] sm:$0xff]  ;;  %s3490_s24 = scalar_lea.hbm %s3546_s5, %s2391_s10 }
  0xab   : > { %v2301_v11 = vcombine.high %v432_v8, %v436_v9 }
  0xad   : > { %2603 = vmatpush3.bf16.msra.mxu1 %v2826_v14  ;;  %v2300_v14 = vcombine.low %v432_v8, %v436_v9 }
  0xaf   : > { %1439 = vmatmul.mubr.bf16.gmra.mxu1 %v2280_v18  ;;  %1536 = vmatmul.mubr.bf16.gmra.mxu0 %v2282_v19 }
  0xb0   : > { %1446 = vmatprep.mubr.bf16.mxu1 %v2289_v20  ;;  %1543 = vmatprep.mubr.bf16.mxu0 %v2291_v21 }
  0xb7   : > { %1447 = vmatmul.mubr.bf16.gmra.mxu1 %v2288_v29  ;;  %1544 = vmatmul.mubr.bf16.gmra.mxu0 %v2290_v30 }
  0xb8   : > { %1454 = vmatprep.mubr.bf16.mxu1 %v2297_v32  ;;  %1551 = vmatprep.mubr.bf16.mxu0 %v2299_v33 }
  0xbf   : > { %1455 = vmatmul.mubr.bf16.gmra.mxu1 %v2296_v41  ;;  %1552 = vmatmul.mubr.bf16.gmra.mxu0 %v2298_v42 }
  0xc0   : > { %1462 = vmatprep.mubr.bf16.mxu1 %v2305_v44  ;;  %1559 = vmatprep.mubr.bf16.mxu0 %v2307_v45 }
  0xc7   : > { %1463 = vmatmul.mubr.bf16.gmra.mxu1 %v2304_v49  ;;  %1560 = vmatmul.mubr.bf16.gmra.mxu0 %v2306_v50 }
  0xc8   : > { %1600 = vmatprep.mubr.bf16.mxu1 %v2253_v51 }
  0xcf   : > { %1601 = vmatmul.mubr.bf16.vlgmr.msra.gmra.mxu1 %v2252_v54 }
  0xd0   : > { %1608 = vmatprep.mubr.bf16.mxu1 %v2261_v55 }
  0xd7   : > { %1609 = vmatmul.mubr.bf16.gmra.mxu1 %v2260_v58 }
  0xd8   : > { %1616 = vmatprep.mubr.bf16.mxu1 %v2269_v59 }
  0xdf   : > { %1617 = vmatmul.mubr.bf16.gmra.mxu1 %v2268_v62 }
  0xe0   : > { %1624 = vmatprep.mubr.bf16.mxu1 %v2277_v63 }
  0xe7   : > { %1625 = vmatmul.mubr.bf16.gmra.mxu1 %v2276_v2 }
  0xe8   : > { %1632 = vmatprep.mubr.bf16.mxu1 %v2285_v3 }
  0xef   : > { %1633 = vmatmul.mubr.bf16.gmra.mxu1 %v2284_v6 }
  0xf0   : > { %1640 = vmatprep.mubr.bf16.mxu1 %v2293_v7 }
  0xf7   : > { %1641 = vmatmul.mubr.bf16.gmra.mxu1 %v2292_v10 }
  0xf8   : > { %1648 = vmatprep.mubr.bf16.mxu1 %v2301_v11 }
  0xff   : > { %1649 = vmatmul.mubr.bf16.gmra.mxu1 %v2300_v14 }
 0x100   : > { %1656 = vmatprep.mubr.bf16.mxu1 %v2309_v15 }
 0x107   : > { %1657 = vmatmul.mubr.bf16.gmra.mxu1 %v2308_v16 }
 0x12f   : > { %v2436_v17 = vpop.f32.mrf.mxu1  ;;  %v2412_v18 = vpop.f32.mrf.mxu0 }
 0x131   : > { %v2437_v19 = vpop.f32.mrf.mxu1  ;;  %v2413_v20 = vpop.f32.mrf.mxu0 }
 0x132   : > { %v3288_v21 = vadd.f32 %v2437_v19, %v2436_v17  ;;  %v2414_v22 = vadd.f32 %v2413_v20, %v2412_v18 }
 0x133   : > { %v2439_v23 = vpop.f32.mrf.mxu1  ;;  %v2415_v24 = vpop.f32.mrf.mxu0 }
 0x135   : > { %v2440_v25 = vpop.f32.mrf.mxu1  ;;  %v2416_v26 = vpop.f32.mrf.mxu0 }
 0x136   : > { %v3290_v27 = vadd.f32 %v2440_v25, %v2439_v23  ;;  %v2417_v28 = vadd.f32 %v2416_v26, %v2415_v24 }
 0x137   : > { %v2442_v29 = vpop.f32.mrf.mxu1  ;;  %v2418_v30 = vpop.f32.mrf.mxu0 }
 0x139   : > { %v2443_v31 = vpop.f32.mrf.mxu1  ;;  %v2419_v32 = vpop.f32.mrf.mxu0 }
 0x13a   : > { %v3292_v33 = vadd.f32 %v2443_v31, %v2442_v29  ;;  %v2420_v34 = vadd.f32 %v2419_v32, %v2418_v30 }
 0x13b   : > { %v2445_v35 = vpop.f32.mrf.mxu1  ;;  %v2421_v36 = vpop.f32.mrf.mxu0 }
 0x13d   : > { %v2446_v37 = vpop.f32.mrf.mxu1  ;;  %v2422_v38 = vpop.f32.mrf.mxu0 }
 0x13e   : > { %v3294_v39 = vadd.f32 %v2446_v37, %v2445_v35  ;;  %v2423_v40 = vadd.f32 %v2422_v38, %v2421_v36 }
 0x13f   : > { %v2448_v41 = vpop.f32.mrf.mxu1  ;;  %v2424_v42 = vpop.f32.mrf.mxu0 }
 0x141   : > { %v2449_v43 = vpop.f32.mrf.mxu1  ;;  %v2425_v44 = vpop.f32.mrf.mxu0 }
 0x142   : > { %v3296_v45 = vadd.f32 %v2449_v43, %v2448_v41  ;;  %v2426_v46 = vadd.f32 %v2425_v44, %v2424_v42 }
 0x143   : > { %v2451_v47 = vpop.f32.mrf.mxu1  ;;  %v2427_v48 = vpop.f32.mrf.mxu0 }
 0x145   : > { %v2452_v49 = vpop.f32.mrf.mxu1  ;;  %v2428_v50 = vpop.f32.mrf.mxu0 }
 0x146   : > { %v3298_v51 = vadd.f32 %v2452_v49, %v2451_v47  ;;  %v2429_v52 = vadd.f32 %v2428_v50, %v2427_v48 }
 0x147   : > { %v2454_v53 = vpop.f32.mrf.mxu1  ;;  %v2430_v54 = vpop.f32.mrf.mxu0 }
 0x149   : > { %v2455_v55 = vpop.f32.mrf.mxu1  ;;  %v2431_v56 = vpop.f32.mrf.mxu0 }
 0x14a   : > { %v3300_v57 = vadd.f32 %v2455_v55, %v2454_v53  ;;  %v2432_v58 = vadd.f32 %v2431_v56, %v2430_v54 }
 0x14b   : > { %v2457_v59 = vpop.f32.mrf.mxu1  ;;  %v2433_v60 = vpop.f32.mrf.mxu0 }
 0x14d   : > { %v2458_v61 = vpop.f32.mrf.mxu1  ;;  %v2434_v62 = vpop.f32.mrf.mxu0 }
 0x14e   : > { %v3302_v63 = vadd.f32 %v2458_v61, %v2457_v59  ;;  %v3304_v0 = vadd.f32 %v2434_v62, %v2433_v60 }
 0x14f   : > { %v2476_v1 = vpop.f32.mrf.mxu1  ;;  %v2540_v2 = vpop.f32.mrf.mxu0 }
 0x151   : > { %v2477_v3 = vpop.f32.mrf.mxu1  ;;  %v2541_v4 = vpop.f32.mrf.mxu0 }
 0x152   : > { %v2478_v5 = vadd.f32 %v2477_v3, %v2476_v1  ;;  %v2542_v6 = vadd.f32 %v2541_v4, %v2540_v2 }
 0x153   : > { %v2479_v7 = vpop.f32.mrf.mxu1  ;;  %v2543_v8 = vpop.f32.mrf.mxu0 }
 0x154   : > { %v1409_v9 = vadd.f32 %v2478_v5, %v2414_v22  ;;  %v3318_v5 = vpop.permute.xlu0 %1804 }
 0x155   : > { %v2480_v10 = vpop.f32.mrf.mxu1  ;;  %v2544_v11 = vpop.f32.mrf.mxu0 }
 0x156   : > { %v3306_v12 = vadd.f32 %v2542_v6, %v1409_v9  ;;  %v2481_v13 = vadd.f32 %v2480_v10, %v2479_v7  ;;  %v2545_v14 = vadd.f32 %v2544_v11, %v2543_v8  ;;  %v3320_v6 = vpop.permute.xlu1 %1794 }
 0x157   : > { %v2482_v15 = vpop.f32.mrf.mxu1  ;;  %v2546_v16 = vpop.f32.mrf.mxu0 }
 0x158   : > { %v1412_v17 = vadd.f32 %v2481_v13, %v2417_v28  ;;  %v3327_v13 = vpop.permute.xlu0 %1809 }
 0x159   : > { %v2483_v18 = vpop.f32.mrf.mxu1  ;;  %v2547_v19 = vpop.f32.mrf.mxu0 }
 0x15a   : > { %v3308_v20 = vadd.f32 %v2545_v14, %v1412_v17  ;;  %v2484_v23 = vadd.f32 %v2483_v18, %v2482_v15  ;;  %v2548_v24 = vadd.f32 %v2547_v19, %v2546_v16  ;;  %v3329_v15 = vpop.permute.xlu1 %1799 }
 0x15b   : > { %v2485_v25 = vpop.f32.mrf.mxu1  ;;  %v2549_v26 = vpop.f32.mrf.mxu0 }
 0x15c   : > { %v1417_v29 = vadd.f32 %v2484_v23, %v2420_v34  ;;  %v3337_v23 = vpop.permute.xlu0 %1784 }
 0x15d   : > { %v2486_v30 = vpop.f32.mrf.mxu1  ;;  %v2550_v22 = vpop.f32.mrf.mxu0 }
 0x15e   : > { %v3310_v31 = vadd.f32 %v2548_v24, %v1417_v29  ;;  %v2487_v32 = vadd.f32 %v2486_v30, %v2485_v25  ;;  %v2551_v35 = vadd.f32 %v2550_v22, %v2549_v26  ;;  %v3339_v24 = vpop.permute.xlu1 %1789 }
 0x15f   : > { %v2488_v36 = vpop.f32.mrf.mxu1  ;;  %v2552_v37 = vpop.f32.mrf.mxu0 }
 0x160   : > { %v1420_v38 = vadd.f32 %v2487_v32, %v2423_v40 }
 0x161   : > { %v2489_v41 = vpop.f32.mrf.mxu1  ;;  %v2553_v28 = vpop.f32.mrf.mxu0 }
 0x162   : > { %v3312_v42 = vadd.f32 %v2551_v35, %v1420_v38  ;;  %v2490_v43 = vadd.f32 %v2489_v41, %v2488_v36  ;;  %v2554_v44 = vadd.f32 %v2553_v28, %v2552_v37  ;;  %v3346_v35 = vpop.permute.xlu1 %1779 }
 0x163   : > { %v2491_v47 = vpop.f32.mrf.mxu1  ;;  %v2555_v48 = vpop.f32.mrf.mxu0 }
 0x164   : > { %v1425_v49 = vadd.f32 %v2490_v43, %v2426_v46 }
 0x165   : > { %v2492_v50 = vpop.f32.mrf.mxu1  ;;  %v2556_v34 = vpop.f32.mrf.mxu0 }
 0x166   : > { %v3314_v53 = vadd.f32 %v2554_v44, %v1425_v49  ;;  %v2493_v54 = vadd.f32 %v2492_v50, %v2491_v47  ;;  %v2557_v55 = vadd.f32 %v2556_v34, %v2555_v48  ;;  %v3358_v44 = vpop.permute.xlu1 %1769 }
 0x167   : > { %v2494_v56 = vpop.f32.mrf.mxu1  ;;  %v2558_v59 = vpop.f32.mrf.mxu0 }
 0x168   : > { %v1428_v60 = vadd.f32 %v2493_v54, %v2429_v52 }
 0x169   : > { %v2495_v61 = vpop.f32.mrf.mxu1  ;;  %v2559_v40 = vpop.f32.mrf.mxu0 }
 0x16a   : > { %v3316_v62 = vadd.f32 %v2557_v55, %v1428_v60  ;;  %v2496_v1 = vadd.f32 %v2495_v61, %v2494_v56  ;;  %v2560_v2 = vadd.f32 %v2559_v40, %v2558_v59 }
 0x16b   : > { %v2497_v3 = vpop.f32.mrf.mxu1  ;;  %v3351_v37 = vpop.f32.mrf.mxu0 }
 0x16c   : > { %v1433_v4 = vadd.f32 %v2496_v1, %v2432_v58  ;;  %v2829_v1 = vld [vmem:[#allocation8 + $0x4] ss:$8 sps:$4 sm:$0xff]  }
 0x16d   : > { %v2498_v46 = vpop.f32.mrf.mxu1  ;;  %v2562_v47 = vpop.f32.mrf.mxu0  ;;  %1988 = vmatprep.mubr.bf16.mxu0 %v2829_v1 }
 0x16e   : > { %v3322_v7 = vadd.f32 %v2560_v2, %v1433_v4  ;;  %v2499_v8 = vadd.f32 %v2498_v46, %v2497_v3 }
 0x16f   : > { %v2500_v9 = vpop.f32.mrf.mxu1  ;;  %v3363_v34 = vpop.f32.mrf.mxu0 }
 0x170   : > { %v3325_v10 = vadd.f32 %v2499_v8, %v3304_v0 }
 0x171   : > { %v2501_v52 = vpop.f32.mrf.mxu1  ;;  %v2565_v61 = vpop.f32.mrf.mxu0 }
 0x172   : > { %v2502_v11 = vadd.f32 %v2501_v52, %v2500_v9 }
 0x173   : > { %v2503_v14 = vpop.f32.mrf.mxu1  ;;  %v2567_v4 = vpop.f32.mrf.mxu0 }
 0x174   : > { %v3332_v58 = vadd.f32 %v2502_v11, %v3288_v21  ;;  %v3344_v21 = vpop.permute.xlu0 %1774 }
 0x175   : > { %v2504_v16 = vpop.f32.mrf.mxu1  ;;  %v2568_v11 = vpop.f32.mrf.mxu0 }
 0x176   : > { %v2505_v17 = vadd.f32 %v2504_v16, %v2503_v14 }
 0x177   : > { %v2506_v18 = vpop.f32.mrf.mxu1 }
 0x178   : > { %v3335_v19 = vadd.f32 %v2505_v17, %v3290_v27 }
 0x179   : > { %v2507_v0 = vpop.f32.mrf.mxu1 }
 0x17a   : > { %v2508_v25 = vadd.f32 %v2507_v0, %v2506_v18 }
 0x17b   : > { %v2509_v26 = vpop.f32.mrf.mxu1 }
 0x17c   : > { %v3342_v29 = vadd.f32 %v2508_v25, %v3292_v33  ;;  %v3356_v33 = vpop.permute.xlu0 %1764  ;;  %v2570_v25 = vpop.f32.mrf.mxu0 }
 0x17d   : > { %v2510_v30 = vpop.f32.mrf.mxu1 }
 0x17e   : > { %v2511_v22 = vadd.f32 %v2510_v30, %v2509_v26 }
 0x17f   : > { %v2512_v32 = vpop.f32.mrf.mxu1 }
 0x180   : > { %v3349_v27 = vadd.f32 %v2511_v22, %v3294_v39  ;;  %v1755_v55 = vpop.permute.xlu0 %1754 }
 0x181   : > { %v2513_v36 = vpop.f32.mrf.mxu1 }
 0x182   : > { %v2514_v38 = vadd.f32 %v2513_v36, %v2512_v32 }
 0x183   : > { %v2515_v41 = vpop.f32.mrf.mxu1 }
 0x184   : > { %v3354_v28 = vadd.f32 %v2514_v38, %v3296_v45  ;;  %v1760_v45 = vpop.permute.xlu1 %1759  ;;  %v1745_v2 = vpop.permute.xlu0 %1744 }
 0x185   : > { %v2516_v43 = vpop.f32.mrf.mxu1 }
 0x186   : > { %v2517_v48 = vadd.f32 %v2516_v43, %v2515_v41  ;;  %v2571_v41 = vpop.f32.mrf.mxu0 }
 0x187   : > { %v2518_v49 = vpop.f32.mrf.mxu1 }
 0x188   : > { %v3361_v50 = vadd.f32 %v2517_v48, %v3298_v51  ;;  %v1750_v51 = vpop.permute.xlu1 %1749  ;;  %v1735_v14 = vpop.permute.xlu0 %1734 }
 0x189   : > { %v2519_v39 = vpop.f32.mrf.mxu1 }
 0x18a   : > { %v2520_v54 = vadd.f32 %v2519_v39, %v2518_v49  ;;  %v2573_v39 = vpop.f32.mrf.mxu0 }
 0x18b   : > { %v3365_v56 = vpop.f32.mrf.mxu1 }
 0x18c   : > { %v3368_v59 = vadd.f32 %v2520_v54, %v3300_v57  ;;  %v1740_v17 = vpop.permute.xlu1 %1739 }
 0x18d   : > { %v3370_v60 = vpop.f32.mrf.mxu1 }
 0x18f   : > { %v2604_v40 = vpop.f32.mrf.mxu1 }
 0x191   : > { %v2605_v3 = vpop.f32.mrf.mxu1 }
 0x192   : > { %v2606_v46 = vadd.f32 %v2605_v3, %v2604_v40 }
 0x193   : > { %v2607_v8 = vpop.f32.mrf.mxu1 }
 0x194   : > { %v1603_v9 = vadd.f32 %v2606_v46, %v3306_v12 }
 0x195   : > { %v2608_v52 = vpop.f32.mrf.mxu1 }
 0x196   : > { %v2609_v16 = vadd.f32 %v2608_v52, %v2607_v8  ;;  %v3374_v26 = vmul.f32 %v1735_v14, %v1603_v9  ;;  %v2574_v9 = vpop.f32.mrf.mxu0 }
 0x197   : > { %v2610_v57 = vpop.f32.mrf.mxu1 }
 0x198   : > { %v1606_v18 = vadd.f32 %v2609_v16, %v3308_v20 }
 0x199   : > { %v2611_v0 = vpop.f32.mrf.mxu1 }
 0x19a   : > { %v3376_v30 = vmul.f32 %v1740_v17, %v1606_v18  ;;  %v2612_v22 = vadd.f32 %v2611_v0, %v2610_v57  ;;  %v2563_v57 = vadd.f32 %v2562_v47, %v3351_v37  ;;  %v2566_v37 = vadd.f32 %v2565_v61, %v3363_v34 }
 0x19b   : > { %v2613_v32 = vpop.f32.mrf.mxu1 }
 0x19c   : > { %v1845_v36 = vpack.c.bf16 %v3376_v30, %v3374_v26  ;;  %v1611_v12 = vadd.f32 %v2612_v22, %v3310_v31  ;;  %v2841_v26 = vld [vmem:[#allocation8 + $0x40] ss:$8 sps:$4 sm:$0xff]   ;;  %v2842_v30 = vld [vmem:[#allocation8 + $0x54] ss:$8 sps:$4 sm:$0xff]  }
 0x19d   : > { %v2614_v38 = vpop.f32.mrf.mxu1 }
 0x19e   : > { %v2615_v43 = vadd.f32 %v2614_v38, %v2613_v32  ;;  %v3382_v54 = vmul.f32 %v1745_v2, %v1611_v12  ;;  %v2576_v2 = vpop.f32.mrf.mxu0  ;;  %v1533_v12 = vadd.f32 %v2563_v57, %v3325_v10 }
 0x19f   : > { %v2616_v48 = vpop.f32.mrf.mxu1 }
 0x1a0   : > { %v1614_v49 = vadd.f32 %v2615_v43, %v3312_v42  ;;  %v2577_v38 = vpop.f32.mrf.mxu0 }
 0x1a1   : > { %v2617_v20 = vpop.f32.mrf.mxu1 }
 0x1a2   : > { %v3384_v40 = vmul.f32 %v1750_v51, %v1614_v49  ;;  %v2618_v1 = vadd.f32 %v2617_v20, %v2616_v48  ;;  %v2569_v48 = vadd.f32 %v2568_v11, %v2567_v4 }
 0x1a3   : > { %v2619_v3 = vpop.f32.mrf.mxu1 }
 0x1a4   : > { %v1619_v46 = vadd.f32 %v2618_v1, %v3314_v53  ;;  %v1847_v8 = vpack.c.bf16 %v3384_v40, %v3382_v54  ;;  %v1541_v34 = vadd.f32 %v2569_v48, %v3335_v19  ;;  %v2835_v54 = vld [vmem:[#allocation8 + $0x20] ss:$8 sps:$4 sm:$0xff]   ;;  %v2836_v40 = vld [vmem:[#allocation8 + $0x34] ss:$8 sps:$4 sm:$0xff]  }
 0x1a5   : > { %v2620_v31 = vpop.f32.mrf.mxu1 }
 0x1a6   : > { %v2621_v52 = vadd.f32 %v2620_v31, %v2619_v3  ;;  %v3391_v17 = vmul.f32 %v1755_v55, %v1619_v46  ;;  %v1538_v3 = vadd.f32 %v2566_v37, %v3332_v58 }
 0x1a7   : > { %v2622_v14 = vpop.f32.mrf.mxu1 }
 0x1a8   : > { %v1622_v16 = vadd.f32 %v2621_v52, %v3316_v62  ;;  %v2572_v52 = vadd.f32 %v2571_v41, %v2570_v25 }
 0x1a9   : > { %v2623_v42 = vpop.f32.mrf.mxu1 }
 0x1aa   : > { %v3393_v51 = vmul.f32 %v1760_v45, %v1622_v16  ;;  %v2624_v18 = vadd.f32 %v2623_v42, %v2622_v14  ;;  %v2579_v45 = vpop.f32.mrf.mxu0  ;;  %v2575_v16 = vadd.f32 %v2574_v9, %v2573_v39 }
 0x1ab   : > { %v2625_v0 = vpop.f32.mrf.mxu1 }
 0x1ac   : > { %v1627_v53 = vadd.f32 %v2624_v18, %v3322_v7  ;;  %v1849_v22 = vpack.c.bf16 %v3393_v51, %v3391_v17  ;;  %v2580_v61 = vpop.f32.mrf.mxu0  ;;  %v1549_v25 = vadd.f32 %v2575_v16, %v3349_v27  ;;  %v2827_v51 = vld [vmem:[#allocation8] ss:$8 sps:$4 sm:$0xff]  }
 0x1ad   : > { %v2626_v32 = vpop.f32.mrf.mxu1 }
 0x1ae   : > { %v2627_v62 = vadd.f32 %v2626_v32, %v2625_v0  ;;  %v3401_v49 = vmul.f32 %v3356_v33, %v1627_v53  ;;  %v1546_v0 = vadd.f32 %v2572_v52, %v3342_v29 }
 0x1af   : > { %v2628_v43 = vpop.f32.mrf.mxu1 }
 0x1b0   : > { %v1630_v47 = vadd.f32 %v2627_v62, %v1533_v12  ;;  %v2578_v12 = vadd.f32 %v2577_v38, %v2576_v2 }
 0x1b1   : > { %v2629_v55 = vpop.f32.mrf.mxu1 }
 0x1b2   : > { %v3404_v7 = vmul.f32 %v3358_v44, %v1630_v47  ;;  %v2630_v20 = vadd.f32 %v2629_v55, %v2628_v43  ;;  %v2582_v44 = vpop.f32.mrf.mxu0  ;;  %v2581_v43 = vadd.f32 %v2580_v61, %v2579_v45  ;;  %v1554_v48 = vadd.f32 %v2578_v12, %v3354_v28 }
 0x1b3   : > { %v2631_v1 = vpop.f32.mrf.mxu1 }
 0x1b4   : > { %v1851_v10 = vpack.c.bf16 %v3404_v7, %v3401_v49  ;;  %v1635_v31 = vadd.f32 %v2630_v20, %v1538_v3  ;;  %v2583_v41 = vpop.f32.mrf.mxu0  ;;  %v1557_v27 = vadd.f32 %v2581_v43, %v3361_v50  ;;  %v2523_v3 = vadd.f32 %v3370_v60, %v3365_v56  ;;  %v1830_v49 = vld [vmem:[%s3435_s8 + $0x10] sm:$0xff]  ;;  %v1831_v7 = vld [vmem:[%s3435_s8 + $0x18] sm:$0xff]  ;;  %v1828_v43 = vld [vmem:[%s3435_s8] sm:$0xff] }
 0x1b5   : > { %v2632_v46 = vpop.f32.mrf.mxu1 }
 0x1b6   : > { %v2633_v4 = vadd.f32 %v2632_v46, %v2631_v1  ;;  %v3411_v42 = vmul.f32 %v3344_v21, %v1635_v31  ;;  %v1468_v31 = vadd.f32 %v2523_v3, %v3302_v63 }
 0x1b7   : > { %v2634_v11 = vpop.f32.mrf.mxu1 }
 0x1b8   : > { %v1638_v33 = vadd.f32 %v2633_v4, %v1541_v34  ;;  %v2584_v34 = vadd.f32 %v2583_v41, %v2582_v44  ;;  %v1837_v41 = vld [vmem:[%s3435_s8 + $0x48] sm:$0xff] }
 0x1b9   : > { %v2635_v14 = vpop.f32.mrf.mxu1 }
 0x1ba   : > { %v3414_v58 = vmul.f32 %v3346_v35, %v1638_v33  ;;  %v2636_v57 = vadd.f32 %v2635_v14, %v2634_v11  ;;  %v2585_v35 = vpop.f32.mrf.mxu0  ;;  %v1562_v52 = vadd.f32 %v2584_v34, %v3368_v59  ;;  %v1842_v14 = vld [vmem:[%s3435_s8 + $0x70] sm:$0xff]  ;;  %v1843_v59 = vld [vmem:[%s3435_s8 + $0x78] sm:$0xff] }
 0x1bb   : > { %v2637_v18 = vpop.f32.mrf.mxu1 }
 0x1bc   : > { %v1853_v19 = vpack.c.bf16 %v3414_v58, %v3411_v42  ;;  %v1643_v32 = vadd.f32 %v2636_v57, %v1546_v0  ;;  %v2586_v2 = vpop.f32.mrf.mxu0  ;;  %v1858_v42 = vpack.c.bf16 %v1843_v59, %v1842_v14  ;;  %v1840_v57 = vld [vmem:[%s3435_s8 + $0x60] sm:$0xff] }
 0x1bd   : > { %v2638_v53 = vpop.f32.mrf.mxu1  ;;  %v2587_v61 = vadd.f32 %v2586_v2, %v2585_v35  ;;  %v1829_v35 = vld [vmem:[%s3435_s8 + $0x8] sm:$0xff] }
 0x1be   : > { %v2639_v39 = vadd.f32 %v2638_v53, %v2637_v18  ;;  %v1822_v37 = vmul.f32 %v3337_v23, %v1643_v32  ;;  %v1841_v18 = vld [vmem:[%s3435_s8 + $0x68] sm:$0xff]  ;;  %v1838_v53 = vld [vmem:[%s3435_s8 + $0x50] sm:$0xff]  ;;  %v1844_v17 = vpack.c.bf16 %v1829_v35, %v1828_v43 }
 0x1bf   : > { %v2640_v9 = vpop.f32.mrf.mxu1  ;;  %v1565_v60 = vadd.f32 %v2587_v61, %v1468_v31  ;;  %v1856_v0 = vpack.c.bf16 %v1841_v18, %v1840_v57 }
 0x1c0   : > { %v1646_v21 = vadd.f32 %v2639_v39, %v1549_v25  ;;  %v1834_v39 = vld [vmem:[%s3435_s8 + $0x30] sm:$0xff] }
 0x1c1   : > { %v2641_v62 = vpop.f32.mrf.mxu1 }
 0x1c2   : > { %v1823_v47 = vmul.f32 %v3339_v24, %v1646_v21  ;;  %v2642_v29 = vadd.f32 %v2641_v62, %v2640_v9  ;;  %v1835_v9 = vld [vmem:[%s3435_s8 + $0x38] sm:$0xff]  ;;  %v1833_v21 = vld [vmem:[%s3435_s8 + $0x28] sm:$0xff] }
 0x1c3   : > { %v2643_v55 = vpop.f32.mrf.mxu1  ;;  %v1850_v12 = vpack.c.bf16 %v1835_v9, %v1834_v39 }
 0x1c4   : > { %v1855_v20 = vpack.c.bf16 %v1823_v47, %v1822_v37  ;;  %v1651_v38 = vadd.f32 %v2642_v29, %v1554_v48  ;;  %v2832_v37 = vld [vmem:[#allocation8 + $0x10] ss:$8 sps:$4 sm:$0xff]   ;;  %v2833_v47 = vld [vmem:[#allocation8 + $0x24] ss:$8 sps:$4 sm:$0xff]   ;;  %v2847_v48 = vld [vmem:[#allocation8 + $0x60] ss:$8 sps:$4 sm:$0xff]  }
 0x1c5   : > { %v2644_v1 = vpop.f32.mrf.mxu1  ;;  %v2839_v29 = vld [vmem:[#allocation8 + $0x44] ss:$8 sps:$4 sm:$0xff]  }
 0x1c6   : > { %v2645_v45 = vadd.f32 %v2644_v1, %v2643_v55  ;;  %v1824_v28 = vmul.f32 %v3320_v6, %v1651_v38  ;;  %v2845_v55 = vld [vmem:[#allocation8 + $0x64] ss:$8 sps:$4 sm:$0xff]   ;;  %v2850_v1 = vld [vmem:[#allocation8 + $0x70] ss:$8 sps:$4 sm:$0xff]  }
 0x1c7   : > { %v2646_v46 = vpop.f32.mrf.mxu1 }
 0x1c8   : > { %v1654_v23 = vadd.f32 %v2645_v45, %v1557_v27 }
 0x1c9   : > { %v2647_v24 = vpop.f32.mrf.mxu1 }
 0x1ca   : > { %v1825_v4 = vmul.f32 %v3329_v15, %v1654_v23  ;;  %v2648_v11 = vadd.f32 %v2647_v24, %v2646_v46 }
 0x1cb   : > { %v2649_v50 = vpop.f32.mrf.mxu1 }
 0x1cc   : > { %v1857_v56 = vpack.c.bf16 %v1825_v4, %v1824_v28  ;;  %v1659_v6 = vadd.f32 %v2648_v11, %v1562_v52 }
 0x1cd   : > { %v2650_v63 = vpop.f32.mrf.mxu1 }
 0x1ce   : > { %v2651_v33 = vadd.f32 %v2650_v63, %v2649_v50  ;;  %v1826_v16 = vmul.f32 %v3318_v5, %v1659_v6  ;;  %v1839_v5 = vld [vmem:[%s3435_s8 + $0x58] sm:$0xff] }
 0x1cf   : > { %v1854_v25 = vpack.c.bf16 %v1839_v5, %v1838_v53 }
 0x1d0   : > { %v1662_v15 = vadd.f32 %v2651_v33, %v1565_v60 }
 0x1d2   : > { %v1827_v44 = vmul.f32 %v3327_v13, %v1662_v15  ;;  %v1836_v13 = vld [vmem:[%s3435_s8 + $0x40] sm:$0xff] }
 0x1d3   : > { %v1852_v32 = vpack.c.bf16 %v1837_v41, %v1836_v13 }
 0x1d4   : > { %v1859_v58 = vpack.c.bf16 %v1827_v44, %v1826_v16 }
 0x1d6   : > { %1956 = vmatprep.subr.bf16.mxu0 %v1859_v58 }
 0x1d7   : > { %1957 = vmatpush1.bf16.xpose.msra.mxu0 %v1858_v42 }
 0x1d8   : > { %1958 = vmatprep.subr.bf16.mxu0 %v1857_v56 }
 0x1df   : > { %1959 = vmatpush1.bf16.xpose.msra.mxu0 %v1856_v0 }
 0x1e0   : > { %1960 = vmatprep.subr.bf16.mxu0 %v1855_v20  ;;  %v2848_v20 = vld [vmem:[#allocation8 + $0x74] ss:$8 sps:$4 sm:$0xff]  }
 0x1e7   : > { %1961 = vmatpush1.bf16.xpose.msra.mxu0 %v1854_v25 }
 0x1e8   : > { %1962 = vmatprep.subr.bf16.mxu0 %v1853_v19  ;;  %v1832_v19 = vld [vmem:[%s3435_s8 + $0x20] sm:$0xff] }
 0x1e9   : > { %v1848_v62 = vpack.c.bf16 %v1833_v21, %v1832_v19 }
 0x1ef   : > { %1963 = vmatpush1.bf16.xpose.msra.mxu0 %v1852_v32 }
 0x1f0   : > { %1964 = vmatprep.subr.bf16.mxu0 %v1851_v10  ;;  %v1846_v10 = vpack.c.bf16 %v1831_v7, %v1830_v49 }
 0x1f7   : > { %1965 = vmatpush1.bf16.xpose.msra.mxu0 %v1850_v12 }
 0x1f8   : > { %1966 = vmatprep.subr.bf16.mxu0 %v1849_v22  ;;  %v2830_v22 = vld [vmem:[#allocation8 + $0x14] ss:$8 sps:$4 sm:$0xff]  }
 0x1ff   : > { %1967 = vmatpush1.bf16.xpose.msra.mxu0 %v1848_v62 }
 0x200   : > { %1968 = vmatprep.subr.bf16.mxu0 %v1847_v8  ;;  %v2838_v8 = vld [vmem:[#allocation8 + $0x30] ss:$8 sps:$4 sm:$0xff]  }
 0x207   : > { %1969 = vmatpush1.bf16.xpose.msra.mxu0 %v1846_v10 }
 0x208   : > { %1970 = vmatprep.subr.bf16.mxu0 %v1845_v36  ;;  %v2844_v36 = vld [vmem:[#allocation8 + $0x50] ss:$8 sps:$4 sm:$0xff]  }
 0x20f   : > { %1971 = vmatpush1.bf16.xpose.msra.mxu0 %v1844_v17 }
 0x216   : > { %1989 = vmatmul.mubr.bf16.vlgmr.msra.gmra.mxu0 %v2827_v51 }
 0x217   : > { %1996 = vmatprep.mubr.bf16.mxu0 %v2830_v22 }
 0x21e   : > { %1997 = vmatmul.mubr.bf16.gmra.mxu0 %v2832_v37 }
 0x21f   : > { %2004 = vmatprep.mubr.bf16.mxu0 %v2833_v47 }
 0x226   : > { %2005 = vmatmul.mubr.bf16.gmra.mxu0 %v2835_v54 }
 0x227   : > { %2012 = vmatprep.mubr.bf16.mxu0 %v2836_v40 }
 0x22e   : > { %2013 = vmatmul.mubr.bf16.gmra.mxu0 %v2838_v8 }
 0x22f   : > { %2020 = vmatprep.mubr.bf16.mxu0 %v2839_v29 }
 0x236   : > { %2021 = vmatmul.mubr.bf16.gmra.mxu0 %v2841_v26 }
 0x237   : > { %2028 = vmatprep.mubr.bf16.mxu0 %v2842_v30 }
 0x23e   : > { %2029 = vmatmul.mubr.bf16.gmra.mxu0 %v2844_v36 }
 0x23f   : > { %2036 = vmatprep.mubr.bf16.mxu0 %v2845_v55 }
 0x246   : > { %2037 = vmatmul.mubr.bf16.gmra.mxu0 %v2847_v48 }
 0x247   : > { %2044 = vmatprep.mubr.bf16.mxu0 %v2848_v20 }
 0x24e   : > { %2045 = vmatmul.mubr.bf16.gmra.mxu0 %v2850_v1 }
 0x2d6   : > { %v1990_v27 = vpop.f32.mrf.mxu0 }
 0x2d7   : > { %v2053_v3 = vmax.f32 %v1990_v27, 0.0 }
 0x2d8   : > { %v1992_v2 = vpop.f32.mrf.mxu0 }
 0x2d9   : > { %2069 = vst [vmem:[%s3468_s13] sm:$0xff] %v2053_v3 }
 0x2da   : > { %v1993_v38 = vpop.f32.mrf.mxu0 }
 0x2db   : > { %v2054_v45 = vmax.f32 %v1993_v38, 0.0 }
 0x2dc   : > { %v1995_v46 = vpop.f32.mrf.mxu0 }
 0x2dd   : > { %2070 = vst [vmem:[%s3468_s13 + $0x8] sm:$0xff] %v2054_v45 }
 0x2de   : > { %v1998_v34 = vpop.f32.mrf.mxu0 }
 0x2df   : > { %v2055_v23 = vmax.f32 %v1998_v34, 0.0 }
 0x2e0   : > { %v2000_v61 = vpop.f32.mrf.mxu0 }
 0x2e1   : > { %2071 = vst [vmem:[%s3468_s13 + $0x10] sm:$0xff] %v2055_v23 }
 0x2e2   : > { %v2001_v24 = vpop.f32.mrf.mxu0 }
 0x2e3   : > { %v2056_v31 = vmax.f32 %v2001_v24, 0.0 }
 0x2e4   : > { %v2003_v28 = vpop.f32.mrf.mxu0 }
 0x2e5   : > { %2072 = vst [vmem:[%s3468_s13 + $0x18] sm:$0xff] %v2056_v31 }
 0x2e6   : > { %v2006_v4 = vpop.f32.mrf.mxu0 }
 0x2e7   : > { %v2057_v11 = vmax.f32 %v2006_v4, 0.0 }
 0x2e8   : > { %v2008_v50 = vpop.f32.mrf.mxu0 }
 0x2e9   : > { %2073 = vst [vmem:[%s3468_s13 + $0x20] sm:$0xff] %v2057_v11 }
 0x2ea   : > { %v2009_v52 = vpop.f32.mrf.mxu0 }
 0x2eb   : > { %v2058_v56 = vmax.f32 %v2009_v52, 0.0 }
 0x2ec   : > { %v2011_v63 = vpop.f32.mrf.mxu0 }
 0x2ed   : > { %2074 = vst [vmem:[%s3468_s13 + $0x28] sm:$0xff] %v2058_v56 }
 0x2ee   : > { %v2014_v60 = vpop.f32.mrf.mxu0 }
 0x2ef   : > { %v2059_v6 = vmax.f32 %v2014_v60, 0.0 }
 0x2f0   : > { %v2016_v33 = vpop.f32.mrf.mxu0 }
 0x2f1   : > { %2075 = vst [vmem:[%s3468_s13 + $0x30] sm:$0xff] %v2059_v6 }
 0x2f2   : > { %v2017_v15 = vpop.f32.mrf.mxu0 }
 0x2f3   : > { %v2060_v14 = vmax.f32 %v2017_v15, 0.0 }
 0x2f4   : > { %v2019_v59 = vpop.f32.mrf.mxu0 }
 0x2f5   : > { %2076 = vst [vmem:[%s3468_s13 + $0x38] sm:$0xff] %v2060_v14 }
 0x2f6   : > { %v2022_v16 = vpop.f32.mrf.mxu0 }
 0x2f7   : > { %v2061_v44 = vmax.f32 %v2022_v16, 0.0 }
 0x2f8   : > { %v2024_v42 = vpop.f32.mrf.mxu0 }
 0x2f9   : > { %2077 = vst [vmem:[%s3468_s13 + $0x40] sm:$0xff] %v2061_v44 }
 0x2fa   : > { %v2025_v58 = vpop.f32.mrf.mxu0 }
 0x2fb   : > { %v2062_v57 = vmax.f32 %v2025_v58, 0.0 }
 0x2fc   : > { %v2027_v18 = vpop.f32.mrf.mxu0 }
 0x2fd   : > { %2078 = vst [vmem:[%s3468_s13 + $0x48] sm:$0xff] %v2062_v57 }
 0x2fe   : > { %v2030_v0 = vpop.f32.mrf.mxu0 }
 0x2ff   : > { %v2063_v53 = vmax.f32 %v2030_v0, 0.0 }
 0x300   : > { %v2032_v5 = vpop.f32.mrf.mxu0 }
 0x301   : > { %2079 = vst [vmem:[%s3468_s13 + $0x50] sm:$0xff] %v2063_v53 }
 0x302   : > { %v2033_v25 = vpop.f32.mrf.mxu0 }
 0x303   : > { %v2064_v13 = vmax.f32 %v2033_v25, 0.0 }
 0x304   : > { %v2035_v41 = vpop.f32.mrf.mxu0 }
 0x305   : > { %2080 = vst [vmem:[%s3468_s13 + $0x58] sm:$0xff] %v2064_v13 }
 0x306   : > { %v2038_v32 = vpop.f32.mrf.mxu0 }
 0x307   : > { %v2065_v39 = vmax.f32 %v2038_v32, 0.0 }
 0x308   : > { %v2040_v9 = vpop.f32.mrf.mxu0 }
 0x309   : > { %2081 = vst [vmem:[%s3468_s13 + $0x60] sm:$0xff] %v2065_v39 }
 0x30a   : > { %v2041_v12 = vpop.f32.mrf.mxu0 }
 0x30b   : > { %v2066_v19 = vmax.f32 %v2041_v12, 0.0 }
 0x30c   : > { %v2043_v21 = vpop.f32.mrf.mxu0 }
 0x30d   : > { %2082 = vst [vmem:[%s3468_s13 + $0x68] sm:$0xff] %v2066_v19 }
 0x30e   : > { %v2046_v62 = vpop.f32.mrf.mxu0 }
 0x30f   : > { %v2067_v49 = vmax.f32 %v2046_v62, 0.0 }
 0x310   : > { %v2048_v7 = vpop.f32.mrf.mxu0 }
 0x311   : > { %2083 = vst [vmem:[%s3468_s13 + $0x70] sm:$0xff] %v2067_v49 }
 0x312   : > { %v2049_v10 = vpop.f32.mrf.mxu0 }
 0x313   : > { %v2068_v43 = vmax.f32 %v2049_v10, 0.0 }
 0x314   : > { %v2051_v35 = vpop.f32.mrf.mxu0 }
 0x315   : > { %2084 = vst [vmem:[%s3468_s13 + $0x78] sm:$0xff] %v2068_v43 }
 0x316   : > { %2944 = shalt.err (!%p2941_p10)
}
 0x317   : > { %s2945_s25 = scalar_lea.hbm %s3490_s24, 2048  ;;  %s2949_s8 = scalar_lea.hbm %s3546_s5, 4096 }
 0x318   : > { %p2946_p1 = scmp.ne.s32.totalorder %s3490_s24, %s2945_s25  ;;  %p2950_p12 = scmp.lt.s32.totalorder %s3490_s24, %s3546_s5 }
 0x319   : > { %p2951_p3 = scmp.lt.s32.totalorder %s2949_s8, %s2945_s25 }
 0x31a   : > { %p2947_p4 = pnand %p2946_p1, %p3156_p7 }
 0x31b   : > { %p2952_p8 = por %p2951_p3, %p2950_p12 }
 0x31c   : > { %p2948_p6 = pneg %p2947_p4 }
 0x31e   : > { %p2953_p9 = pnand %p2952_p8, %p2948_p6 }
 0x320   : > { %2956 = shalt.err (!%p2953_p9)
}
 0x321   : > { %s3028_s10 = smov 128   ;;  %s3029_s16 = smov 256  }
 0x322   : > { %s3030_s3 = smov 8  }
 0x323   : > { %2678 = dma.vmem_to_hbm [thread:$0]  (%p3156_p7), %s3492_s15, 2048, %s3490_s24, %s2086_s26, %s3028_s10, %s3029_s16, %s3030_s3  }
 0x324 PF: > { %s2113_s21 = sand.u32 1, %s2995_s18   ;;  %p3562_p11 = scmp.ne.s32.totalorder %s3554_s29, 0 }
 0x325   : > { %p3563_p2 = scmp.ge.s32.totalorder %s3015_s23, 2  ;;  %s2114_s28 = scalar_lea.sflag [#allocation5], %s2113_s21 }
 0x327   : > { %p2692_p13 = pnand %p3563_p2, %p3562_p11 }
 0x329   : > { %p2693_p0 = pneg %p2692_p13 }
 0x32b   : > { %2990 = dma.done.wait (%p2693_p0), %s2114_s28, 2048  }
 0x32c   : > { %2992 = vsyncadd (%p2693_p0), %s2114_s28, 4294965248  ;;  %s22_s23 = sadd.s32 1, %s3015_s23   ;;  %s3564_s18 = smov %s2999_s19 }
 0x32d   : > { %p19_p5 = scmp.ge.s32.totalorder %s22_s23, 4   ;;  %s3565_s19 = smov %s3003_s20 }
 0x32e   : > { %s3566_s20 = smov %s3165_s14  ;;  %s3567_s21 = smov %s3011_s22 }
 0x32f   : > { %s3568_s22 = smov %s3570_s7  ;;  %21 = sbr.rel (!%p19_p5) target bundleno = 9 (0x9), region = 108 }
 0x334   :  { %2119 = vsyncpa [#allocation4], 1 }
 0x335   :  { %2121 = vsyncpa [#allocation4 + $0x1], 1 }
 0x336   :  { %2122 = vsyncpa [#allocation7], 1 }
 0x337   :  { %2123 = vsyncpa [#allocation5], 1 }
 0x338   :  { %2125 = vsyncpa [#allocation5 + $0x1], 1 }

</bundles_post_ra>
